<compile_context>
chip_gen: v6e
topology: v6e:2x2x1
jax: 0.10.0
libtpu: 0.0.40
codegen_flags: <defaults>
</compile_context>

<pallas_src>
import jax
import jax.numpy as jnp
from jax.experimental import pallas as pl
from jax.experimental.pallas import tpu as pltpu

# ---- sizes (lane-aligned, consistent with the module's forward) ----
B = 256         # batch (amortizes launch/DMA latency; must be a multiple of TB)
TB = 128        # batch tile per grid step (multiple of 8 sublanes)
D_IN = 32       # input_shape = (32,)
N_ACT = 8       # n_actions
N_ACT_PAD = 16  # action K-dim padded to one bf16 sublane tile; padded Wa rows are zero
H1 = 128        # h1_size (400 in the original; shrunk + lane-aligned)
H2 = 128        # h2_size (300 in the original; shrunk + lane-aligned)
LN_EPS = 1e-5   # torch.nn.LayerNorm default

D_XA = D_IN + N_ACT_PAD          # merged [state | action | 0-pad] lane width
W_ROWS = D_IN + H1 + N_ACT_PAD   # bf16 weight slab rows: W1 | W2 | Wa(padded)

# Row indices inside the f32 parameter slab.
R_B1, R_G1, R_BE1, R_B2, R_G2, R_BE2, R_BA, R_WO, R_BO = range(9)
P_ROWS = 9


def _layernorm(x, g, b):
    # One-pass moments: the two lane reductions are independent, so they
    # overlap on the XLU; with TB=128 rows the XLU pipelines across rows.
    # TODO(synk): E[x^2]-E[x]^2 (clamped) deviates from PyTorch's two-pass
    # variance; fine at these magnitudes, guarded by the f32 reference check.
    mu = jnp.mean(x, axis=-1, keepdims=True)
    ms = jnp.mean(x * x, axis=-1, keepdims=True)
    var = jnp.maximum(ms - mu * mu, 0.0)
    return (x - mu) * jax.lax.rsqrt(var + LN_EPS) * g + b


def critic_kernel(xa_ref, w_ref, p_ref, out_ref):
    """One TB-row slice of the CriticNetwork forward, fully VMEM-resident."""
    xa = xa_ref[...]                                   # [TB, D_XA] f32
    x = xa[:, :D_IN].astype(jnp.bfloat16)              # [TB, D_IN]
    a = xa[:, D_IN:].astype(jnp.bfloat16)              # [TB, N_ACT_PAD]

    # Packed bf16 weights — static, 16-sublane-aligned slices of the slab.
    w1 = w_ref[0:D_IN, :]                              # [D_IN, H1]
    w2 = w_ref[D_IN:D_IN + H1, :]                      # [H1, H2]
    wa = w_ref[D_IN + H1:W_ROWS, :]                    # [N_ACT_PAD, H2]

    # Packed f32 vector parameters — static row slices.
    row = lambda r: p_ref[r:r + 1, :]                  # [1, H2]
    b1, g1, be1 = row(R_B1), row(R_G1), row(R_BE1)
    b2, g2, be2 = row(R_B2), row(R_G2), row(R_BE2)
    ba, wo = row(R_BA), row(R_WO)
    bo = row(R_BO)[:, 0:1]                             # [1, 1]

    # layer 1: Linear -> LayerNorm -> ReLU (bf16 MXU operands, f32 accumulate)
    h1 = jnp.dot(x, w1, preferred_element_type=jnp.float32) + b1
    h1 = jnp.maximum(_layernorm(h1, g1, be1), 0.0)

    # layer 2: Linear -> LayerNorm
    h2 = jnp.dot(h1.astype(jnp.bfloat16), w2,
                 preferred_element_type=jnp.float32) + b2
    h2 = _layernorm(h2, g2, be2)

    # action branch: Linear(N_ACT -> H2), bf16 single MXU pass (padded lanes
    # multiply zero padded Wa rows -> exact).
    av = jnp.dot(a, wa, preferred_element_type=jnp.float32) + ba

    # q = relu(state_path + action_path); out_layer as VPU multiply + lane reduce
    q = jnp.maximum(h2 + av, 0.0)
    out = jnp.sum(q * wo, axis=-1, keepdims=True) + bo
    out_ref[...] = out.astype(out_ref.dtype)


@jax.jit
def critic_forward(state, action, wslab, pslab):
    bsz = state.shape[0]
    assert bsz % TB == 0, "batch must be a multiple of the batch tile TB"
    # Merge state + action (+ zero pad) into one input slab -> one DMA.
    pad = jnp.zeros((bsz, N_ACT_PAD - N_ACT), state.dtype)
    xa = jnp.concatenate([state, action, pad], axis=1)          # [bsz, D_XA]

    flops = 2 * bsz * (D_IN * H1 + H1 * H2 + N_ACT_PAD * H2 + H2)
    bytes_accessed = xa.size * 4 + wslab.size * 2 + pslab.size * 4 + bsz * 4

    return pl.pallas_call(
        critic_kernel,
        out_shape=jax.ShapeDtypeStruct((bsz, 1), jnp.float32),
        grid_spec=pltpu.PrefetchScalarGridSpec(
            num_scalar_prefetch=0,
            grid=(bsz // TB,),
            in_specs=[
                pl.BlockSpec((TB, D_XA), lambda i: (i, 0)),      # batch tile
                pl.BlockSpec((W_ROWS, H1), lambda i: (0, 0)),    # resident weights
                pl.BlockSpec((P_ROWS, H2), lambda i: (0, 0)),    # resident params
            ],
            out_specs=pl.BlockSpec((TB, 1), lambda i: (i, 0)),
        ),
        compiler_params=pltpu.CompilerParams(
            dimension_semantics=("parallel",)),                  # megacore split on v7x
        cost_estimate=pl.CostEstimate(
            flops=flops, transcendentals=2 * bsz, bytes_accessed=bytes_accessed),
    )(xa, wslab, pslab)


def init_params(key):
    """Mirrors CriticNetwork.init_weights(): PyTorch weight.size()[0] is the
    *output* dim, so fan bounds are 1/sqrt(H1), 1/sqrt(H2), 1/sqrt(H2), 0.003."""
    ks = jax.random.split(key, 8)
    u = lambda k, shape, lim: jax.random.uniform(k, shape, jnp.float32, -lim, lim)
    f1, f2, fact, fout = 1.0 / H1 ** 0.5, 1.0 / H2 ** 0.5, 1.0 / H2 ** 0.5, 0.003

    w1 = u(ks[0], (D_IN, H1), f1)
    b1 = u(ks[1], (1, H1), f1)
    g1 = jnp.ones((1, H1), jnp.float32)
    be1 = jnp.zeros((1, H1), jnp.float32)

    w2 = u(ks[2], (H1, H2), f2)
    b2 = u(ks[3], (1, H2), f2)
    g2 = jnp.ones((1, H2), jnp.float32)
    be2 = jnp.zeros((1, H2), jnp.float32)

    wa = u(ks[4], (N_ACT, H2), fact)
    ba = u(ks[5], (1, H2), fact)

    wo = u(ks[6], (1, H2), fout)              # out_layer weight, PyTorch layout [1, H2]
    bo = u(ks[7], (1, 1), fout)
    return (w1, b1, g1, be1, w2, b2, g2, be2, wa, ba, wo, bo)


def pack_params(params):
    """Pack the 12 parameter tensors into 2 contiguous slabs (done once)."""
    (w1, b1, g1, be1, w2, b2, g2, be2, wa, ba, wo, bo) = params
    assert H1 == H2, "single-slab packing assumes equal, lane-aligned layer widths"
    wa_pad = jnp.zeros((N_ACT_PAD, H2), jnp.float32).at[:N_ACT, :].set(wa)
    wslab = jnp.concatenate([w1, w2, wa_pad], axis=0).astype(jnp.bfloat16)   # [W_ROWS, H1]
    bo_row = jnp.broadcast_to(bo, (1, H2))
    pslab = jnp.concatenate([b1, g1, be1, b2, g2, be2, ba, wo, bo_row],
                            axis=0).astype(jnp.float32)                      # [P_ROWS, H2]
    assert wslab.shape == (W_ROWS, H1)
    assert pslab.shape == (P_ROWS, H2)
    return wslab, pslab


def _ln_f32(x, g, b):
    mu = jnp.mean(x, axis=-1, keepdims=True)
    var = jnp.mean((x - mu) ** 2, axis=-1, keepdims=True)
    return (x - mu) * jax.lax.rsqrt(var + LN_EPS) * g + b


def reference_f32(state, action, params):
    """Pure-f32 reference mirroring the PyTorch forward exactly."""
    (w1, b1, g1, be1, w2, b2, g2, be2, wa, ba, wo, bo) = params
    h1 = jax.nn.relu(_ln_f32(state @ w1 + b1, g1, be1))
    h2 = _ln_f32(h1 @ w2 + b2, g2, be2)
    av = action @ wa + ba
    q = jax.nn.relu(h2 + av)
    return q @ wo.T + bo


def reference_mixed(state, action, params):
    """Reference mirroring the kernel's bf16 MXU casts / fused-variance LN."""
    (w1, b1, g1, be1, w2, b2, g2, be2, wa, ba, wo, bo) = params

    def ln(x, g, b):
        mu = jnp.mean(x, axis=-1, keepdims=True)
        ms = jnp.mean(x * x, axis=-1, keepdims=True)
        var = jnp.maximum(ms - mu * mu, 0.0)
        return (x - mu) * jax.lax.rsqrt(var + LN_EPS) * g + b

    h1 = jnp.dot(state.astype(jnp.bfloat16), w1.astype(jnp.bfloat16),
                 preferred_element_type=jnp.float32) + b1
    h1 = jax.nn.relu(ln(h1, g1, be1))
    h2 = jnp.dot(h1.astype(jnp.bfloat16), w2.astype(jnp.bfloat16),
                 preferred_element_type=jnp.float32) + b2
    h2 = ln(h2, g2, be2)
    av = jnp.dot(action.astype(jnp.bfloat16), wa.astype(jnp.bfloat16),
                 preferred_element_type=jnp.float32) + ba
    q = jax.nn.relu(h2 + av)
    return jnp.sum(q * wo, axis=-1, keepdims=True) + bo


if __name__ == "__main__":
    key = jax.random.PRNGKey(0)
    k_state, k_action, k_params = jax.random.split(key, 3)
    state = jax.random.normal(k_state, (B, D_IN), jnp.float32)
    action = jax.random.normal(k_action, (B, N_ACT), jnp.float32)

    params = init_params(k_params)
    wslab, pslab = pack_params(params)   # packed once, outside the forward

    out = critic_forward(state, action, wslab, pslab)
    jax.block_until_ready(out)
    assert out.shape == (B, 1)

    # Tight check: same bf16 casts / fused-variance LN as the kernel.
    ref_mixed = reference_mixed(state, action, params)
    assert jnp.allclose(out, ref_mixed, atol=2e-3, rtol=2e-3), "mismatch vs mixed ref"

    # Loose check: pure-f32 PyTorch-equivalent forward (bf16 weight precision).
    ref_f32 = reference_f32(state, action, params)
    assert jnp.allclose(out, ref_f32, atol=2e-2, rtol=2e-2), "mismatch vs f32 ref"

    print("KERNEL_OK")
</pallas_src>

<mosaic_0001>
module attributes {stable_mosaic.version = 11 : i64} {
  func.func @critic_kernel(%arg0: i32, %arg1: memref<128x48xf32, #tpu.memory_space<vmem>>, %arg2: memref<176x128xbf16, #tpu.memory_space<vmem>>, %arg3: memref<9x128xf32, #tpu.memory_space<vmem>>, %arg4: memref<128x1xf32, #tpu.memory_space<vmem>>) attributes {dimension_semantics = [#tpu.dimension_semantics<parallel>], iteration_bounds = array<i64: 2>, scalar_prefetch = 0 : i64, scratch_operands = 0 : i64, tpu.core_type = #tpu.core_type<tc>, window_params = [{transform_indices = @transform_0, window_bounds = array<i64: 128, 48>}, {pipeline_mode = #tpu.pipeline_mode<synchronous>, transform_indices = @transform_1, window_bounds = array<i64: 176, 128>}, {pipeline_mode = #tpu.pipeline_mode<synchronous>, transform_indices = @transform_2, window_bounds = array<i64: 9, 128>}, {transform_indices = @transform_3, window_bounds = array<i64: 128, 1>}]} {
    %c0 = arith.constant 0 : index
    %c0_0 = arith.constant 0 : index
    %0 = vector.load %arg1[%c0, %c0_0] : memref<128x48xf32, #tpu.memory_space<vmem>>, vector<128x48xf32>
    %1 = vector.extract_strided_slice %0 {offsets = [0, 0], sizes = [128, 32], strides = [1, 1]} : vector<128x48xf32> to vector<128x32xf32>
    %2 = arith.truncf %1 : vector<128x32xf32> to vector<128x32xbf16>
    %3 = vector.extract_strided_slice %0 {offsets = [0, 32], sizes = [128, 16], strides = [1, 1]} : vector<128x48xf32> to vector<128x16xf32>
    %4 = arith.truncf %3 : vector<128x16xf32> to vector<128x16xbf16>
    %c0_1 = arith.constant 0 : index
    %c0_2 = arith.constant 0 : index
    %5 = vector.load %arg2[%c0_1, %c0_2] : memref<176x128xbf16, #tpu.memory_space<vmem>>, vector<32x128xbf16>
    %c32 = arith.constant 32 : index
    %c0_3 = arith.constant 0 : index
    %6 = vector.load %arg2[%c32, %c0_3] : memref<176x128xbf16, #tpu.memory_space<vmem>>, vector<128x128xbf16>
    %c160 = arith.constant 160 : index
    %c0_4 = arith.constant 0 : index
    %7 = vector.load %arg2[%c160, %c0_4] : memref<176x128xbf16, #tpu.memory_space<vmem>>, vector<16x128xbf16>
    %c0_5 = arith.constant 0 : index
    %c0_6 = arith.constant 0 : index
    %8 = vector.load %arg3[%c0_5, %c0_6] : memref<9x128xf32, #tpu.memory_space<vmem>>, vector<1x128xf32>
    %c1 = arith.constant 1 : index
    %c0_7 = arith.constant 0 : index
    %9 = vector.load %arg3[%c1, %c0_7] : memref<9x128xf32, #tpu.memory_space<vmem>>, vector<1x128xf32>
    %c2 = arith.constant 2 : index
    %c0_8 = arith.constant 0 : index
    %10 = vector.load %arg3[%c2, %c0_8] : memref<9x128xf32, #tpu.memory_space<vmem>>, vector<1x128xf32>
    %c3 = arith.constant 3 : index
    %c0_9 = arith.constant 0 : index
    %11 = vector.load %arg3[%c3, %c0_9] : memref<9x128xf32, #tpu.memory_space<vmem>>, vector<1x128xf32>
    %c4 = arith.constant 4 : index
    %c0_10 = arith.constant 0 : index
    %12 = vector.load %arg3[%c4, %c0_10] : memref<9x128xf32, #tpu.memory_space<vmem>>, vector<1x128xf32>
    %c5 = arith.constant 5 : index
    %c0_11 = arith.constant 0 : index
    %13 = vector.load %arg3[%c5, %c0_11] : memref<9x128xf32, #tpu.memory_space<vmem>>, vector<1x128xf32>
    %c6 = arith.constant 6 : index
    %c0_12 = arith.constant 0 : index
    %14 = vector.load %arg3[%c6, %c0_12] : memref<9x128xf32, #tpu.memory_space<vmem>>, vector<1x128xf32>
    %c7 = arith.constant 7 : index
    %c0_13 = arith.constant 0 : index
    %15 = vector.load %arg3[%c7, %c0_13] : memref<9x128xf32, #tpu.memory_space<vmem>>, vector<1x128xf32>
    %c8 = arith.constant 8 : index
    %c0_14 = arith.constant 0 : index
    %16 = vector.load %arg3[%c8, %c0_14] : memref<9x128xf32, #tpu.memory_space<vmem>>, vector<1x128xf32>
    %17 = vector.extract_strided_slice %16 {offsets = [0, 0], sizes = [1, 1], strides = [1, 1]} : vector<1x128xf32> to vector<1x1xf32>
    %cst = arith.constant dense<0.000000e+00> : vector<128x128xf32>
    %18 = tpu.matmul %2, %5, %cst {dimension_numbers = #tpu.dot_dimension_numbers<[1], [0], [0], [1], [0, 0, 1, 1], [], []>} : vector<128x32xbf16>, vector<32x128xbf16>, vector<128x128xf32> -> vector<128x128xf32>
    %19 = vector.broadcast %8 : vector<1x128xf32> to vector<128x128xf32>
    %20 = arith.addf %18, %19 : vector<128x128xf32>
    %cst_15 = arith.constant dense<0.000000e+00> : vector<128xf32>
    %21 = vector.multi_reduction <add>, %20, %cst_15 [1] : vector<128x128xf32> to vector<128xf32>
    %22 = vector.shape_cast %21 : vector<128xf32> to vector<128x1xf32>
    %cst_16 = arith.constant 1.280000e+02 : f32
    %23 = vector.broadcast %cst_16 : f32 to vector<128x1xf32>
    %24 = arith.divf %22, %23 : vector<128x1xf32>
    %25 = arith.mulf %20, %20 : vector<128x128xf32>
    %cst_17 = arith.constant dense<0.000000e+00> : vector<128xf32>
    %26 = vector.multi_reduction <add>, %25, %cst_17 [1] : vector<128x128xf32> to vector<128xf32>
    %27 = vector.shape_cast %26 : vector<128xf32> to vector<128x1xf32>
    %cst_18 = arith.constant 1.280000e+02 : f32
    %28 = vector.broadcast %cst_18 : f32 to vector<128x1xf32>
    %29 = arith.divf %27, %28 : vector<128x1xf32>
    %30 = arith.mulf %24, %24 : vector<128x1xf32>
    %31 = arith.subf %29, %30 : vector<128x1xf32>
    %cst_19 = arith.constant 0.000000e+00 : f32
    %32 = vector.broadcast %cst_19 : f32 to vector<128x1xf32>
    %33 = arith.maximumf %31, %32 : vector<128x1xf32>
    %34 = vector.broadcast %24 : vector<128x1xf32> to vector<128x128xf32>
    %35 = arith.subf %20, %34 : vector<128x128xf32>
    %cst_20 = arith.constant 9.99999974E-6 : f32
    %36 = vector.broadcast %cst_20 : f32 to vector<128x1xf32>
    %37 = arith.addf %33, %36 : vector<128x1xf32>
    %38 = math.rsqrt %37 : vector<128x1xf32>
    %39 = vector.broadcast %38 : vector<128x1xf32> to vector<128x128xf32>
    %40 = arith.mulf %35, %39 : vector<128x128xf32>
    %41 = vector.broadcast %9 : vector<1x128xf32> to vector<128x128xf32>
    %42 = arith.mulf %40, %41 : vector<128x128xf32>
    %43 = vector.broadcast %10 : vector<1x128xf32> to vector<128x128xf32>
    %44 = arith.addf %42, %43 : vector<128x128xf32>
    %cst_21 = arith.constant 0.000000e+00 : f32
    %45 = vector.broadcast %cst_21 : f32 to vector<128x128xf32>
    %46 = arith.maximumf %44, %45 : vector<128x128xf32>
    %47 = arith.truncf %46 : vector<128x128xf32> to vector<128x128xbf16>
    %cst_22 = arith.constant dense<0.000000e+00> : vector<128x128xf32>
    %48 = tpu.matmul %47, %6, %cst_22 {dimension_numbers = #tpu.dot_dimension_numbers<[1], [0], [0], [1], [0, 0, 1, 1], [], []>} : vector<128x128xbf16>, vector<128x128xbf16>, vector<128x128xf32> -> vector<128x128xf32>
    %49 = vector.broadcast %11 : vector<1x128xf32> to vector<128x128xf32>
    %50 = arith.addf %48, %49 : vector<128x128xf32>
    %cst_23 = arith.constant dense<0.000000e+00> : vector<128xf32>
    %51 = vector.multi_reduction <add>, %50, %cst_23 [1] : vector<128x128xf32> to vector<128xf32>
    %52 = vector.shape_cast %51 : vector<128xf32> to vector<128x1xf32>
    %cst_24 = arith.constant 1.280000e+02 : f32
    %53 = vector.broadcast %cst_24 : f32 to vector<128x1xf32>
    %54 = arith.divf %52, %53 : vector<128x1xf32>
    %55 = arith.mulf %50, %50 : vector<128x128xf32>
    %cst_25 = arith.constant dense<0.000000e+00> : vector<128xf32>
    %56 = vector.multi_reduction <add>, %55, %cst_25 [1] : vector<128x128xf32> to vector<128xf32>
    %57 = vector.shape_cast %56 : vector<128xf32> to vector<128x1xf32>
    %cst_26 = arith.constant 1.280000e+02 : f32
    %58 = vector.broadcast %cst_26 : f32 to vector<128x1xf32>
    %59 = arith.divf %57, %58 : vector<128x1xf32>
    %60 = arith.mulf %54, %54 : vector<128x1xf32>
    %61 = arith.subf %59, %60 : vector<128x1xf32>
    %cst_27 = arith.constant 0.000000e+00 : f32
    %62 = vector.broadcast %cst_27 : f32 to vector<128x1xf32>
    %63 = arith.maximumf %61, %62 : vector<128x1xf32>
    %64 = vector.broadcast %54 : vector<128x1xf32> to vector<128x128xf32>
    %65 = arith.subf %50, %64 : vector<128x128xf32>
    %cst_28 = arith.constant 9.99999974E-6 : f32
    %66 = vector.broadcast %cst_28 : f32 to vector<128x1xf32>
    %67 = arith.addf %63, %66 : vector<128x1xf32>
    %68 = math.rsqrt %67 : vector<128x1xf32>
    %69 = vector.broadcast %68 : vector<128x1xf32> to vector<128x128xf32>
    %70 = arith.mulf %65, %69 : vector<128x128xf32>
    %71 = vector.broadcast %12 : vector<1x128xf32> to vector<128x128xf32>
    %72 = arith.mulf %70, %71 : vector<128x128xf32>
    %73 = vector.broadcast %13 : vector<1x128xf32> to vector<128x128xf32>
    %74 = arith.addf %72, %73 : vector<128x128xf32>
    %cst_29 = arith.constant dense<0.000000e+00> : vector<128x128xf32>
    %75 = tpu.matmul %4, %7, %cst_29 {dimension_numbers = #tpu.dot_dimension_numbers<[1], [0], [0], [1], [0, 0, 1, 1], [], []>} : vector<128x16xbf16>, vector<16x128xbf16>, vector<128x128xf32> -> vector<128x128xf32>
    %76 = vector.broadcast %14 : vector<1x128xf32> to vector<128x128xf32>
    %77 = arith.addf %75, %76 : vector<128x128xf32>
    %78 = arith.addf %74, %77 : vector<128x128xf32>
    %cst_30 = arith.constant 0.000000e+00 : f32
    %79 = vector.broadcast %cst_30 : f32 to vector<128x128xf32>
    %80 = arith.maximumf %78, %79 : vector<128x128xf32>
    %81 = vector.broadcast %15 : vector<1x128xf32> to vector<128x128xf32>
    %82 = arith.mulf %80, %81 : vector<128x128xf32>
    %cst_31 = arith.constant dense<0.000000e+00> : vector<128xf32>
    %83 = vector.multi_reduction <add>, %82, %cst_31 [1] : vector<128x128xf32> to vector<128xf32>
    %84 = vector.shape_cast %83 : vector<128xf32> to vector<128x1xf32>
    %85 = vector.broadcast %17 : vector<1x1xf32> to vector<128x1xf32>
    %86 = arith.addf %84, %85 : vector<128x1xf32>
    %c0_32 = arith.constant 0 : index
    %c0_33 = arith.constant 0 : index
    %87 = vector.load %arg4[%c0_32, %c0_33] : memref<128x1xf32, #tpu.memory_space<vmem>>, vector<128x1xf32>
    tpu.vector_store %arg4[%c0_32, %c0_33], %86 {strides = array<i32>} : memref<128x1xf32, #tpu.memory_space<vmem>>, vector<128x1xf32>,
    return
  }
  func.func @transform_0(%arg0: i32) -> (i32, i32) {
    %c0_i32 = arith.constant 0 : i32
    %c0_i32_0 = arith.constant 0 : i32
    return %arg0, %c0_i32 : i32, i32
  }
  func.func @transform_1(%arg0: i32) -> (i32, i32) {
    %c0_i32 = arith.constant 0 : i32
    %c0_i32_0 = arith.constant 0 : i32
    %c0_i32_1 = arith.constant 0 : i32
    return %c0_i32, %c0_i32_0 : i32, i32
  }
  func.func @transform_2(%arg0: i32) -> (i32, i32) {
    %c0_i32 = arith.constant 0 : i32
    %c0_i32_0 = arith.constant 0 : i32
    %c0_i32_1 = arith.constant 0 : i32
    return %c0_i32, %c0_i32_0 : i32, i32
  }
  func.func @transform_3(%arg0: i32) -> (i32, i32) {
    %c0_i32 = arith.constant 0 : i32
    %c0_i32_0 = arith.constant 0 : i32
    return %arg0, %c0_i32 : i32, i32
  }
}

</mosaic_0001>

<bundles_post_ra>
// kernel: critic_forward.1
= control target key start
LH: loop header
LB: loop body
LE: loop exit
PB: predicated region body
PF: predicated region fallthrough
CT: control target
= control target key end

     0   :  { %s1668_s12 = smov 0   ;;  %s2349_s0 = inlined_call_operand.vmem [shape: f32[256,48], index: 0, kind: input, shape index: {}]   ;;  %s2350_s1 = inlined_call_operand.vmem [shape: bf16[176,128], index: 1, kind: input, shape index: {}]   ;;  %s2351_s2 = inlined_call_operand.vmem [shape: f32[9,128], index: 2, kind: input, shape index: {}]   ;;  %s2352_s3 = inlined_call_operand.vmem [shape: f32[256,1], index: 3, kind: output, shape index: {}]  }
   0x1 LB: > { %s1403_s13 = sadd.s32 4294967295, %s1645_s12   ;;  %p1407_p0 = scmp.ge.s32.totalorder %s1645_s12, 1  ;;  %s1645_s12 = sphi %s1668_s12, %s13_s12  }
   0x2   : > { %p138_p1 = scmp.lt.s32.totalorder %s1645_s12, 3 }
   0x4   : > { %p139_p2 = pnand %p1407_p0, %p138_p1 }
   0x5   : > { %s1408_s16 = sshll.u32 (!%p139_p2), %s1403_s13, 4  ;;  %s1647_s18 = smov (!%p139_p2), 96  }
   0x6   : > { %142 = sbr.rel (%p139_p2) target bundleno = 975 (0x3cf), region = 32  ;;  %p163_p3 = scmp.lt.s32.totalorder (!%p139_p2), %s1408_s16, 31 }
   0xb   : > { %v1564_v0 = vld [vmem:[%s2350_s1 + $0x8] sm:$0xff]   ;;  %v1565_v1 = vld [vmem:[%s2350_s1] sm:$0xff]   ;;  %s2354_s16 = smov (!%p163_p3, %s1408_s16), 31  ;;  %vm246_vm0 = vcmask 261120   ;;  %v1568_v61 = vld [vmem:[%s2350_s1 + $0x38] sm:$0xff]   ;;  %vm1104_vm1 = vcmask 130048  }
   0xc   : > { %1485 = vmatprep.subr.bf16.mxu0 %v1564_v0  ;;  %s1409_s19 = sshll.u32 %s2354_s16, 3  ;;  %v1743_v26 = vld [vmem:[%s2351_s2] ss:$0 sm:$0xff]  ;;  %v1566_v52 = vld [vmem:[%s2350_s1 + $0x48] sm:$0xff]   ;;  %vm1330_vm2 = vcmask 7168  }
   0xd   : > { %1486 = vmatpush3.bf16.msra.mxu0 %v1564_v0  ;;  %s1690_s22 = scalar_lea.vmem %s2349_s0, %s1409_s19  ;;  %1505 = vmatprep.subr.bf16.mxu1 %v1566_v52  ;;  %v1567_v56 = vld [vmem:[%s2350_s1 + $0x40] sm:$0xff]   ;;  %s2312_s11 = scalar_lea.vmem %s2352_s3, %s1409_s19 }
   0xe   : > { %1487 = vmatprep.subr.bf16.mxu0 %v1565_v1  ;;  %v175_v2 = vld [vmem:[%s1690_s22] sm:$0xff]  ;;  %v176_v3 = vld [vmem:[%s1690_s22 + $0x8] sm:$0xff]  ;;  %v177_v4 = vld [vmem:[%s1690_s22 + $0x10] sm:$0xff]  ;;  %1506 = vmatpush3.bf16.msra.mxu1 %v1566_v52 }
   0xf   : > { %v1695_v5 = vpack.c.bf16 %v176_v3, %v175_v2  ;;  %v178_v6 = vld [vmem:[%s1690_s22 + $0x18] sm:$0xff]  ;;  %v179_v7 = vld [vmem:[%s1690_s22 + $0x20] sm:$0xff]  ;;  %v180_v8 = vld [vmem:[%s1690_s22 + $0x28] sm:$0xff]  ;;  %1507 = vmatprep.subr.bf16.mxu1 %v1567_v56 }
  0x10   : > { %v1700_v9 = vpack.c.bf16 %v178_v6, %v177_v4  ;;  %v1702_v10 = vpack.c.bf16 %v180_v8, %v179_v7  ;;  %v181_v11 = vld [vmem:[%s1690_s22 + $0x30] sm:$0xff]  ;;  %v182_v12 = vld [vmem:[%s1690_s22 + $0x38] sm:$0xff]  ;;  %v183_v13 = vld [vmem:[%s1690_s22 + $0x40] sm:$0xff] }
  0x11   : > { %1488 = vmatpush3.bf16.msra.mxu0 %v1565_v1  ;;  %1489 = vmatprep.mubr.msk.bf16.mxu0 %vm246_vm0, %v1695_v5  ;;  %v184_v14 = vld [vmem:[%s1690_s22 + $0x48] sm:$0xff]  ;;  %v1714_v15 = vpack.c.bf16 %v182_v12, %v181_v11  ;;  %v185_v17 = vld [vmem:[%s1690_s22 + $0x50] sm:$0xff]  ;;  %v186_v18 = vld [vmem:[%s1690_s22 + $0x58] sm:$0xff] }
  0x12   : > { %v1716_v16 = vpack.c.bf16 %v184_v14, %v183_v13  ;;  %v187_v19 = vld [vmem:[%s1690_s22 + $0x60] sm:$0xff]  ;;  %v188_v20 = vld [vmem:[%s1690_s22 + $0x68] sm:$0xff]  ;;  %v1726_v21 = vpack.c.bf16 %v186_v18, %v185_v17  ;;  %v189_v23 = vld [vmem:[%s1690_s22 + $0x70] sm:$0xff]  ;;  %1508 = vmatpush3.bf16.msra.mxu1 %v1567_v56 }
  0x13   : > { %v1728_v22 = vpack.c.bf16 %v188_v20, %v187_v19  ;;  %v190_v24 = vld [vmem:[%s1690_s22 + $0x78] sm:$0xff]  ;;  %1509 = vmatprep.subr.bf16.mxu1 %v1568_v61  ;;  %v1569_v1 = vld [vmem:[%s2350_s1 + $0x30] sm:$0xff]   ;;  %v1570_v6 = vld [vmem:[%s2350_s1 + $0x28] sm:$0xff]  }
  0x14   : > { %1490 = vmatmul.mubr.msk.bf16.vlgmr.msra.gmra.mxu0 %vm246_vm0, %v1700_v9  ;;  %v1736_v25 = vpack.c.bf16 %v190_v24, %v189_v23  ;;  %v1571_v12 = vld [vmem:[%s2350_s1 + $0x20] sm:$0xff]   ;;  %v1572_v17 = vld [vmem:[%s2350_s1 + $0x18] sm:$0xff]   ;;  %v1573_v20 = vld [vmem:[%s2350_s1 + $0x10] sm:$0xff]  }
  0x15   : > { %1493 = vmatprep.mubr.msk.bf16.mxu0 %vm246_vm0, %v1702_v10 }
  0x16   : > { %1510 = vmatpush3.bf16.msra.mxu1 %v1568_v61 }
  0x17   : > { %1511 = vmatprep.subr.bf16.mxu1 %v1569_v1 }
  0x1a   : > { %1512 = vmatpush3.bf16.msra.mxu1 %v1569_v1 }
  0x1b   : > { %1513 = vmatprep.subr.bf16.mxu1 %v1570_v6 }
  0x1c   : > { %1494 = vmatmul.mubr.msk.bf16.gmra.mxu0 %vm246_vm0, %v1714_v15 }
  0x1d   : > { %1497 = vmatprep.mubr.msk.bf16.mxu0 %vm246_vm0, %v1716_v16 }
  0x1e   : > { %1514 = vmatpush3.bf16.msra.mxu1 %v1570_v6 }
  0x1f   : > { %1515 = vmatprep.subr.bf16.mxu1 %v1571_v12 }
  0x22   : > { %1516 = vmatpush3.bf16.msra.mxu1 %v1571_v12 }
  0x23   : > { %1517 = vmatprep.subr.bf16.mxu1 %v1572_v17 }
  0x24   : > { %1498 = vmatmul.mubr.msk.bf16.gmra.mxu0 %vm246_vm0, %v1726_v21 }
  0x25   : > { %1501 = vmatprep.mubr.msk.bf16.mxu0 %vm246_vm0, %v1728_v22 }
  0x26   : > { %1518 = vmatpush3.bf16.msra.mxu1 %v1572_v17 }
  0x27   : > { %1519 = vmatprep.subr.bf16.mxu1 %v1573_v20 }
  0x2a   : > { %1520 = vmatpush3.bf16.msra.mxu1 %v1573_v20 }
  0x2c   : > { %1502 = vmatmul.mubr.msk.bf16.gmra.mxu0 %vm246_vm0, %v1736_v25 }
  0xd4   : > { %v1491_v27 = vpop.f32.mrf.mxu0 }
  0xd5   : > { %v1746_v28 = vadd.f32 %v1491_v27, %v1743_v26  ;;  %v1574_v27 = vld [vmem:[%s2350_s1 + $0x50] sm:$0xff]  }
  0xd6   : > { %v305_v29 = vpop.f32.mrf.mxu0  ;;  %1537 = vmatprep.subr.bf16.mxu0 %v1574_v27 }
  0xd7   : > { %v1749_v30 = vadd.f32 %v1743_v26, %v305_v29  ;;  %372 = vadd.xlane.f32.xlu1 %v1746_v28  ;;  %v419_v34 = vmul.f32 %v1746_v28, %v1746_v28  ;;  %1538 = vmatpush3.bf16.msra.mxu0 %v1574_v27 }
  0xd8   : > { %v1492_v31 = vpop.f32.mrf.mxu0 }
  0xd9   : > { %v1753_v32 = vadd.f32 %v1492_v31, %v1743_v26  ;;  %368 = vadd.xlane.f32.xlu0 %v1749_v30  ;;  %v417_v39 = vmul.f32 %v1749_v30, %v1749_v30 }
  0xda   : > { %v308_v33 = vpop.f32.mrf.mxu0 }
  0xdb   : > { %374 = vadd.xlane.f32.xlu1 %v1753_v32  ;;  %v1760_v36 = vadd.f32 %v1743_v26, %v308_v33  ;;  %v420_v37 = vmul.f32 %v1753_v32, %v1753_v32 }
  0xdc   : > { %v1495_v35 = vpop.f32.mrf.mxu0 }
  0xdd   : > { %437 = vadd.xlane.f32.xlu0 %v419_v34  ;;  %v418_v40 = vmul.f32 %v1760_v36, %v1760_v36  ;;  %v1773_v44 = vadd.f32 %v1495_v35, %v1743_v26 }
  0xde   : > { %v321_v38 = vpop.f32.mrf.mxu0 }
  0xdf   : > { %439 = vadd.xlane.f32.xlu1 %v420_v37  ;;  %v1781_v47 = vadd.f32 %v1743_v26, %v321_v38  ;;  %v423_v50 = vmul.f32 %v1773_v44, %v1773_v44 }
  0xe0   : > { %v1496_v41 = vpop.f32.mrf.mxu0 }
  0xe1   : > { %433 = vadd.xlane.f32.xlu0 %v417_v39  ;;  %v1769_v42 = vadd.f32 %v1496_v41, %v1743_v26  ;;  %v421_v55 = vmul.f32 %v1781_v47, %v1781_v47 }
  0xe2   : > { %v324_v43 = vpop.f32.mrf.mxu0 }
  0xe3   : > { %435 = vadd.xlane.f32.xlu1 %v418_v40  ;;  %v1777_v45 = vadd.f32 %v1743_v26, %v324_v43  ;;  %v424_v48 = vmul.f32 %v1769_v42, %v1769_v42 }
  0xe4   : > { %v1499_v46 = vpop.f32.mrf.mxu0 }
  0xe5   : > { %370 = vadd.xlane.f32.xlu0 %v1760_v36  ;;  %v422_v51 = vmul.f32 %v1777_v45, %v1777_v45  ;;  %v1803_v58 = vadd.f32 %v1499_v46, %v1743_v26 }
  0xe6   : > { %v337_v49 = vpop.f32.mrf.mxu0 }
  0xe7   : > { %382 = vadd.xlane.f32.xlu1 %v1769_v42  ;;  %v1814_v62 = vadd.f32 %v1743_v26, %v337_v49  ;;  %v427_v2 = vmul.f32 %v1803_v58, %v1803_v58 }
  0xe8   : > { %v1500_v53 = vpop.f32.mrf.mxu0 }
  0xe9   : > { %380 = vadd.xlane.f32.xlu0 %v1773_v44  ;;  %v1795_v54 = vadd.f32 %v1500_v53, %v1743_v26  ;;  %v425_v8 = vmul.f32 %v1814_v62, %v1814_v62 }
  0xea   : > { %v340_v57 = vpop.f32.mrf.mxu0 }
  0xeb   : > { %378 = vadd.xlane.f32.xlu1 %v1777_v45  ;;  %v1807_v60 = vadd.f32 %v1743_v26, %v340_v57  ;;  %v428_v0 = vmul.f32 %v1795_v54, %v1795_v54 }
  0xec   : > { %v1503_v59 = vpop.f32.mrf.mxu0 }
  0xed   : > { %376 = vadd.xlane.f32.xlu0 %v1781_v47  ;;  %v426_v4 = vmul.f32 %v1807_v60, %v1807_v60  ;;  %v1836_v11 = vadd.f32 %v1503_v59, %v1743_v26 }
  0xee   : > { %v353_v63 = vpop.f32.mrf.mxu0 }
  0xef   : > { %447 = vadd.xlane.f32.xlu1 %v424_v48  ;;  %v1850_v18 = vadd.f32 %v1743_v26, %v353_v63 }
  0xf0   : > { %v1504_v3 = vpop.f32.mrf.mxu0 }
  0xf1   : > { %445 = vadd.xlane.f32.xlu0 %v423_v50  ;;  %v1831_v7 = vadd.f32 %v1504_v3, %v1743_v26  ;;  %v429_v23 = vmul.f32 %v1850_v18, %v1850_v18 }
  0xf2   : > { %v356_v13 = vpop.f32.mrf.mxu0 }
  0xf3   : > { %443 = vadd.xlane.f32.xlu1 %v422_v51  ;;  %v1843_v14 = vadd.f32 %v1743_v26, %v356_v13  ;;  %v432_v24 = vmul.f32 %v1831_v7, %v1831_v7  ;;  %v431_v26 = vmul.f32 %v1836_v11, %v1836_v11 }
  0xf5   : > { %441 = vadd.xlane.f32.xlu0 %v421_v55  ;;  %v430_v19 = vmul.f32 %v1843_v14, %v1843_v14 }
  0xf7   : > { %390 = vadd.xlane.f32.xlu1 %v1795_v54 }
  0xf9   : > { %388 = vadd.xlane.f32.xlu0 %v1803_v58 }
  0xfb   : > { %386 = vadd.xlane.f32.xlu1 %v1807_v60 }
  0xfd   : > { %384 = vadd.xlane.f32.xlu0 %v1814_v62 }
  0xff   : > { %455 = vadd.xlane.f32.xlu1 %v428_v0 }
 0x101   : > { %453 = vadd.xlane.f32.xlu0 %v427_v2 }
 0x103   : > { %451 = vadd.xlane.f32.xlu1 %v426_v4 }
 0x105   : > { %449 = vadd.xlane.f32.xlu0 %v425_v8 }
 0x107   : > { %398 = vadd.xlane.f32.xlu1 %v1831_v7 }
 0x109   : > { %396 = vadd.xlane.f32.xlu0 %v1836_v11 }
 0x10b   : > { %394 = vadd.xlane.f32.xlu1 %v1843_v14 }
 0x10d   : > { %392 = vadd.xlane.f32.xlu0 %v1850_v18 }
 0x10f   : > { %459 = vadd.xlane.f32.xlu1 %v430_v19 }
 0x111   : > { %457 = vadd.xlane.f32.xlu0 %v429_v23 }
 0x113   : > { %463 = vadd.xlane.f32.xlu1 %v432_v24 }
 0x115   : > { %461 = vadd.xlane.f32.xlu0 %v431_v26 }
 0x124   : > { %1084 = vrot.lane.b32.xlu1 %v1700_v9, %s1647_s18 }
 0x128   : > { %1086 = vrot.lane.b32.xlu1 %v1702_v10, %s1647_s18 }
 0x12b   : > { %1082 = vrot.lane.b32.xlu0 %v1695_v5, %s1647_s18 }
 0x12c   : > { %1088 = vrot.lane.b32.xlu1 %v1714_v15, %s1647_s18 }
 0x12f   : > { %1090 = vrot.lane.b32.xlu0 %v1716_v16, %s1647_s18 }
 0x130   : > { %1092 = vrot.lane.b32.xlu1 %v1726_v21, %s1647_s18 }
 0x133   : > { %1094 = vrot.lane.b32.xlu0 %v1728_v22, %s1647_s18 }
 0x134   : > { %1096 = vrot.lane.b32.xlu1 %v1736_v25, %s1647_s18 }
 0x160   : > { %v373_v29 = vpop.xlane.xlu1 %372 }
 0x161   : > { %v1876_v33 = vmul.f32 0.0078125, %v373_v29 }
 0x162   : > { %v369_v31 = vpop.xlane.xlu0 %368 }
 0x163   : > { %v483_v10 = vmul.f32 %v1876_v33, %v1876_v33  ;;  %v1882_v16 = vmul.f32 0.0078125, %v369_v31 }
 0x164   : > { %v375_v5 = vpop.xlane.xlu1 %374 }
 0x165   : > { %v1878_v9 = vmul.f32 0.0078125, %v375_v5  ;;  %v481_v38 = vmul.f32 %v1882_v16, %v1882_v16 }
 0x166   : > { %v438_v34 = vpop.xlane.xlu0 %437 }
 0x167   : > { %v467_v15 = vmul.f32 0.0078125, %v438_v34  ;;  %v484_v21 = vmul.f32 %v1878_v9, %v1878_v9 }
 0x168   : > { %v440_v35 = vpop.xlane.xlu1 %439 }
 0x169   : > { %v499_v22 = vsub.f32 %v467_v15, %v483_v10  ;;  %v468_v25 = vmul.f32 0.0078125, %v440_v35  ;;  %v532_v15 = vsub.f32 %v1753_v32, %v1878_v9 }
 0x16a   : > { %v434_v37 = vpop.xlane.xlu0 %433 }
 0x16b   : > { %v515_v39 = vmax.f32 %v499_v22, 0.0  ;;  %v500_v40 = vsub.f32 %v468_v25, %v484_v21  ;;  %v465_v41 = vmul.f32 0.0078125, %v434_v37 }
 0x16c   : > { %v436_v43 = vpop.xlane.xlu1 %435 }
 0x16d   : > { %v516_v46 = vmax.f32 %v500_v40, 0.0  ;;  %v497_v48 = vsub.f32 %v465_v41, %v481_v38  ;;  %v547_v49 = vadd.f32 1e-05, %v515_v39  ;;  %v466_v57 = vmul.f32 0.0078125, %v436_v43 }
 0x16e   : > { %v371_v50 = vpop.xlane.xlu0 %370  ;;  %v531_v41 = vsub.f32 %v1746_v28, %v1876_v33  ;;  %v529_v43 = vsub.f32 %v1749_v30, %v1882_v16 }
 0x16f   : > { %v548_v51 = vadd.f32 1e-05, %v516_v46  ;;  %v513_v52 = vmax.f32 %v497_v48, 0.0  ;;  %v1888_v53 = vmul.f32 0.0078125, %v371_v50 }
 0x170   : > { %v383_v55 = vpop.xlane.xlu1 %382 }
 0x171   : > { %1575 = vrsqrt.f32 %v548_v51  ;;  %v545_v56 = vadd.f32 1e-05, %v513_v52  ;;  %v482_v59 = vmul.f32 %v1888_v53, %v1888_v53  ;;  %v1892_v2 = vmul.f32 0.0078125, %v383_v55 }
 0x172   : > { %1577 = vrsqrt.f32 %v547_v49  ;;  %v381_v61 = vpop.xlane.xlu0 %380  ;;  %v530_v33 = vsub.f32 %v1760_v36, %v1888_v53 }
 0x173   : > { %1579 = vrsqrt.f32 %v545_v56  ;;  %v498_v63 = vsub.f32 %v466_v57, %v482_v59  ;;  %v1894_v6 = vmul.f32 0.0078125, %v381_v61  ;;  %v488_v12 = vmul.f32 %v1892_v2, %v1892_v2  ;;  %v1917_v57 = vld [vmem:[%s2351_s2 + $0x1] ss:$0 sm:$0xff] }
 0x174   : > { %v379_v0 = vpop.xlane.xlu1 %378 }
 0x175   : > { %v514_v1 = vmax.f32 %v498_v63, 0.0  ;;  %v1898_v13 = vmul.f32 0.0078125, %v379_v0  ;;  %v487_v23 = vmul.f32 %v1894_v6, %v1894_v6 }
 0x176   : > { %v377_v3 = vpop.xlane.xlu0 %376 }
 0x177   : > { %v546_v4 = vadd.f32 1e-05, %v514_v1  ;;  %v1900_v19 = vmul.f32 0.0078125, %v377_v3  ;;  %v486_v29 = vmul.f32 %v1898_v13, %v1898_v13 }
 0x178   : > { %v448_v8 = vpop.xlane.xlu1 %447 }
 0x179   : > { %1581 = vrsqrt.f32 %v546_v4  ;;  %v472_v17 = vmul.f32 0.0078125, %v448_v8  ;;  %v485_v35 = vmul.f32 %v1900_v19, %v1900_v19  ;;  %v1931_v8 = vld [vmem:[%s2351_s2 + $0x2] ss:$0 sm:$0xff] }
 0x17a   : > { %v446_v20 = vpop.xlane.xlu0 %445 }
 0x17b   : > { %v504_v24 = vsub.f32 %v472_v17, %v488_v12  ;;  %v471_v26 = vmul.f32 0.0078125, %v446_v20 }
 0x17c   : > { %v444_v27 = vpop.xlane.xlu1 %443 }
 0x17d   : > { %v520_v31 = vmax.f32 %v504_v24, 0.0  ;;  %v503_v5 = vsub.f32 %v471_v26, %v487_v23  ;;  %v470_v34 = vmul.f32 0.0078125, %v444_v27 }
 0x17e   : > { %v1576_v10 = vpop.eup %1575  ;;  %v442_v21 = vpop.xlane.xlu0 %441 }
 0x17f   : > { %v1578_v22 = vpop.eup %1577  ;;  %v552_v25 = vadd.f32 1e-05, %v520_v31  ;;  %v519_v37 = vmax.f32 %v503_v5, 0.0  ;;  %v502_v38 = vsub.f32 %v470_v34, %v486_v29  ;;  %v469_v39 = vmul.f32 0.0078125, %v442_v21 }
 0x180   : > { %v1580_v40 = vpop.eup %1579  ;;  %v391_v46 = vpop.xlane.xlu1 %390  ;;  %v580_v48 = vmul.f32 %v1576_v10, %v532_v15  ;;  %v579_v52 = vmul.f32 %v1578_v22, %v531_v41 }
 0x181   : > { %1583 = vrsqrt.f32 %v552_v25  ;;  %v551_v32 = vadd.f32 1e-05, %v519_v37  ;;  %v518_v9 = vmax.f32 %v502_v38, 0.0  ;;  %v501_v49 = vsub.f32 %v469_v39, %v485_v35 }
 0x182   : > { %v389_v50 = vpop.xlane.xlu0 %388  ;;  %v577_v51 = vmul.f32 %v1580_v40, %v529_v43  ;;  %v600_v30 = vmul.f32 %v1917_v57, %v580_v48  ;;  %v1922_v59 = vmul.f32 0.0078125, %v391_v46  ;;  %v599_v1 = vmul.f32 %v1917_v57, %v579_v52 }
 0x183   : > { %1585 = vrsqrt.f32 %v551_v32  ;;  %v550_v55 = vadd.f32 1e-05, %v518_v9  ;;  %v517_v56 = vmax.f32 %v501_v49, 0.0  ;;  %v1926_v4 = vmul.f32 0.0078125, %v389_v50 }
 0x184   : > { %v387_v28 = vpop.xlane.xlu1 %386  ;;  %v597_v0 = vmul.f32 %v1917_v57, %v577_v51  ;;  %v620_v12 = vadd.f32 %v1931_v8, %v600_v30  ;;  %v492_v17 = vmul.f32 %v1922_v59, %v1922_v59  ;;  %v619_v29 = vadd.f32 %v1931_v8, %v599_v1 }
 0x185   : > { %1587 = vrsqrt.f32 %v550_v55  ;;  %v549_v16 = vadd.f32 1e-05, %v517_v56  ;;  %v1933_v36 = vmul.f32 0.0078125, %v387_v28  ;;  %v491_v31 = vmul.f32 %v1926_v4, %v1926_v4 }
 0x186   : > { %v1582_v61 = vpop.eup %1581  ;;  %v385_v63 = vpop.xlane.xlu0 %384  ;;  %v617_v27 = vadd.f32 %v1931_v8, %v597_v0  ;;  %v636_v21 = vmax.f32 %v620_v12, 0.0  ;;  %v536_v40 = vsub.f32 %v1769_v42, %v1892_v2  ;;  %v635_v48 = vmax.f32 %v619_v29, 0.0 }
 0x187   : > { %v578_v3 = vmul.f32 %v1582_v61, %v530_v33  ;;  %1589 = vrsqrt.f32 %v549_v16  ;;  %v1939_v24 = vmul.f32 0.0078125, %v385_v63  ;;  %v490_v15 = vmul.f32 %v1933_v36, %v1933_v36 }
 0x188   : > { %v456_v53 = vpop.xlane.xlu1 %455  ;;  %v633_v46 = vmax.f32 %v617_v27, 0.0  ;;  %v535_v52 = vsub.f32 %v1773_v44, %v1894_v6  ;;  %v650_v28 = vpack.c.bf16 %v636_v21, %v635_v48  ;;  %v534_v61 = vsub.f32 %v1777_v45, %v1898_v13 }
 0x189   : > { %v476_v20 = vmul.f32 0.0078125, %v456_v53  ;;  %v598_v23 = vmul.f32 %v1917_v57, %v578_v3  ;;  %v489_v41 = vmul.f32 %v1939_v24, %v1939_v24  ;;  %v533_v6 = vsub.f32 %v1781_v47, %v1900_v19 }
 0x18a   : > { %v454_v26 = vpop.xlane.xlu0 %453 }
 0x18b   : > { %v508_v5 = vsub.f32 %v476_v20, %v492_v17  ;;  %v475_v34 = vmul.f32 0.0078125, %v454_v26  ;;  %v618_v10 = vadd.f32 %v1931_v8, %v598_v23 }
 0x18c   : > { %v452_v35 = vpop.xlane.xlu1 %451 }
 0x18d   : > { %v524_v22 = vmax.f32 %v508_v5, 0.0  ;;  %v507_v25 = vsub.f32 %v475_v34, %v491_v31  ;;  %v474_v37 = vmul.f32 0.0078125, %v452_v35  ;;  %v634_v38 = vmax.f32 %v618_v10, 0.0 }
 0x18e   : > { %v1584_v39 = vpop.eup %1583  ;;  %v450_v43 = vpop.xlane.xlu0 %449 }
 0x18f   : > { %v556_v32 = vadd.f32 1e-05, %v524_v22  ;;  %v523_v9 = vmax.f32 %v507_v25, 0.0  ;;  %v506_v49 = vsub.f32 %v474_v37, %v490_v15  ;;  %v473_v50 = vmul.f32 0.0078125, %v450_v43 }
 0x190   : > { %v1586_v51 = vpop.eup %1585  ;;  %v399_v55 = vpop.xlane.xlu1 %398  ;;  %v649_v56 = vpack.c.bf16 %v634_v38, %v633_v46  ;;  %v584_v30 = vmul.f32 %v1584_v39, %v536_v40 }
 0x191   : > { %1591 = vrsqrt.f32 %v556_v32  ;;  %v555_v42 = vadd.f32 1e-05, %v523_v9  ;;  %v522_v2 = vmax.f32 %v506_v49, 0.0  ;;  %v505_v33 = vsub.f32 %v473_v50, %v489_v41 }
 0x192   : > { %v1588_v16 = vpop.eup %1587  ;;  %1521 = vmatprep.mubr.bf16.mxu1 %v649_v56  ;;  %v397_v63 = vpop.xlane.xlu0 %396  ;;  %v583_v0 = vmul.f32 %v1586_v51, %v535_v52  ;;  %v604_v20 = vmul.f32 %v1917_v57, %v584_v30  ;;  %v1969_v10 = vmul.f32 0.0078125, %v399_v55  ;;  %v540_v52 = vsub.f32 %v1795_v54, %v1922_v59 }
 0x193   : > { %1593 = vrsqrt.f32 %v555_v42  ;;  %v554_v1 = vadd.f32 1e-05, %v522_v2  ;;  %v521_v3 = vmax.f32 %v505_v33, 0.0  ;;  %1522 = vmatmul.mubr.bf16.vlgmr.msra.gmra.mxu1 %v650_v28  ;;  %v582_v12 = vmul.f32 %v1588_v16, %v534_v61 }
 0x194   : > { %v1590_v44 = vpop.eup %1589  ;;  %v395_v53 = vpop.xlane.xlu1 %394  ;;  %v603_v17 = vmul.f32 %v1917_v57, %v583_v0  ;;  %v624_v34 = vadd.f32 %v1931_v8, %v604_v20  ;;  %v1973_v21 = vmul.f32 0.0078125, %v397_v63  ;;  %v496_v32 = vmul.f32 %v1969_v10, %v1969_v10 }
 0x195   : > { %1595 = vrsqrt.f32 %v554_v1  ;;  %v553_v23 = vadd.f32 1e-05, %v521_v3  ;;  %v1960_v45 = vmul.f32 0.0078125, %v395_v53  ;;  %v581_v26 = vmul.f32 %v1590_v44, %v533_v6 }
 0x196   : > { %v393_v13 = vpop.xlane.xlu0 %392  ;;  %v602_v27 = vmul.f32 %v1917_v57, %v582_v12  ;;  %v623_v29 = vadd.f32 %v1931_v8, %v603_v17  ;;  %v640_v48 = vmax.f32 %v624_v34, 0.0  ;;  %v495_v55 = vmul.f32 %v1973_v21, %v1973_v21 }
 0x197   : > { %1597 = vrsqrt.f32 %v553_v23  ;;  %v1964_v31 = vmul.f32 0.0078125, %v393_v13  ;;  %v601_v19 = vmul.f32 %v1917_v57, %v581_v26  ;;  %v494_v15 = vmul.f32 %v1960_v45, %v1960_v45 }
 0x198   : > { %v460_v47 = vpop.xlane.xlu1 %459  ;;  %v622_v5 = vadd.f32 %v1931_v8, %v602_v27  ;;  %v639_v37 = vmax.f32 %v623_v29, 0.0  ;;  %v539_v63 = vsub.f32 %v1803_v58, %v1926_v4  ;;  %v538_v0 = vsub.f32 %v1807_v60, %v1933_v36 }
 0x199   : > { %v478_v35 = vmul.f32 0.0078125, %v460_v47  ;;  %v621_v25 = vadd.f32 %v1931_v8, %v601_v19  ;;  %v493_v38 = vmul.f32 %v1964_v31, %v1964_v31  ;;  %v537_v6 = vsub.f32 %v1814_v62, %v1939_v24 }
 0x19a   : > { %v458_v22 = vpop.xlane.xlu0 %457  ;;  %v638_v46 = vmax.f32 %v622_v5, 0.0  ;;  %v652_v30 = vpack.c.bf16 %v640_v48, %v639_v37  ;;  %v541_v37 = vsub.f32 %v1850_v18, %v1964_v31 }
 0x19b   : > { %v510_v39 = vsub.f32 %v478_v35, %v494_v15  ;;  %v477_v40 = vmul.f32 0.0078125, %v458_v22  ;;  %v637_v43 = vmax.f32 %v621_v25, 0.0  ;;  %v542_v15 = vsub.f32 %v1843_v14, %v1960_v45 }
 0x19c   : > { %v464_v41 = vpop.xlane.xlu1 %463  ;;  %v543_v45 = vsub.f32 %v1836_v11, %v1973_v21 }
 0x19d   : > { %v526_v9 = vmax.f32 %v510_v39, 0.0  ;;  %v509_v49 = vsub.f32 %v477_v40, %v493_v38  ;;  %v480_v50 = vmul.f32 0.0078125, %v464_v41  ;;  %v651_v28 = vpack.c.bf16 %v638_v46, %v637_v43 }
 0x19e   : > { %v1592_v51 = vpop.eup %1591  ;;  %v462_v56 = vpop.xlane.xlu0 %461  ;;  %v544_v40 = vsub.f32 %v1831_v7, %v1969_v10 }
 0x19f   : > { %v558_v42 = vadd.f32 1e-05, %v526_v9  ;;  %v525_v2 = vmax.f32 %v509_v49, 0.0  ;;  %v512_v33 = vsub.f32 %v480_v50, %v496_v32  ;;  %v479_v16 = vmul.f32 0.0078125, %v462_v56  ;;  %1525 = vmatprep.mubr.bf16.mxu1 %v651_v28 }
 0x1a0   : > { %v1594_v61 = vpop.eup %1593  ;;  %v588_v1 = vmul.f32 %v1592_v51, %v540_v52  ;;  %1526 = vmatmul.mubr.bf16.gmra.mxu1 %v652_v30  ;;  %v1085_v14 = vpop.permute.xlu1 %1084 }
 0x1a1   : > { %1599 = vrsqrt.f32 %v558_v42  ;;  %v557_v54 = vadd.f32 1e-05, %v525_v2  ;;  %v528_v59 = vmax.f32 %v512_v33, 0.0  ;;  %v511_v3 = vsub.f32 %v479_v16, %v495_v55 }
 0x1a2   : > { %v1596_v44 = vpop.eup %1595  ;;  %v587_v53 = vmul.f32 %v1594_v61, %v539_v63  ;;  %v608_v60 = vmul.f32 %v1917_v57, %v588_v1  ;;  %v1083_v48 = vpop.permute.xlu0 %1082 }
 0x1a3   : > { %1601 = vrsqrt.f32 %v557_v54  ;;  %v560_v12 = vadd.f32 1e-05, %v528_v59  ;;  %v527_v17 = vmax.f32 %v511_v3, 0.0  ;;  %v586_v20 = vmul.f32 %v1596_v44, %v538_v0  ;;  %1539 = vmatprep.mubr.msk.bf16.mxu0 %vm1104_vm1, %v1083_v48 }
 0x1a4   : > { %v1598_v58 = vpop.eup %1597  ;;  %v607_v4 = vmul.f32 %v1917_v57, %v587_v53  ;;  %v628_v27 = vadd.f32 %v1931_v8, %v608_v60  ;;  %1540 = vmatmul.mubr.msk.bf16.vlgmr.msra.gmra.mxu0 %vm1104_vm1, %v1085_v14  ;;  %v1087_v50 = vpop.permute.xlu1 %1086 }
 0x1a5   : > { %1603 = vrsqrt.f32 %v560_v12  ;;  %v559_v36 = vadd.f32 1e-05, %v527_v17  ;;  %v585_v23 = vmul.f32 %v1598_v58, %v537_v6  ;;  %v606_v13 = vmul.f32 %v1917_v57, %v586_v20  ;;  %1543 = vmatprep.mubr.msk.bf16.mxu0 %vm1104_vm1, %v1087_v50 }
 0x1a6   : > { %v627_v26 = vadd.f32 %v1931_v8, %v607_v4  ;;  %v644_v34 = vmax.f32 %v628_v27, 0.0  ;;  %v1091_v33 = vpop.permute.xlu0 %1090 }
 0x1a7   : > { %1605 = vrsqrt.f32 %v559_v36  ;;  %v605_v62 = vmul.f32 %v1917_v57, %v585_v23  ;;  %v626_v24 = vadd.f32 %v1931_v8, %v606_v13 }
 0x1a8   : > { %v643_v47 = vmax.f32 %v627_v26, 0.0  ;;  %v1089_v28 = vpop.permute.xlu1 %1088 }
 0x1a9   : > { %v625_v29 = vadd.f32 %v1931_v8, %v605_v62  ;;  %v642_v5 = vmax.f32 %v626_v24, 0.0 }
 0x1aa   : > { %v654_v25 = vpack.c.bf16 %v644_v34, %v643_v47 }
 0x1ab   : > { %v641_v19 = vmax.f32 %v625_v29, 0.0 }
 0x1ac   : > { %1544 = vmatmul.mubr.msk.bf16.gmra.mxu0 %vm1104_vm1, %v1089_v28  ;;  %v1093_v16 = vpop.permute.xlu1 %1092 }
 0x1ad   : > { %v653_v35 = vpack.c.bf16 %v642_v5, %v641_v19  ;;  %1547 = vmatprep.mubr.msk.bf16.mxu0 %vm1104_vm1, %v1091_v33 }
 0x1ae   : > { %v1600_v22 = vpop.eup %1599 }
 0x1af   : > { %1529 = vmatprep.mubr.bf16.mxu1 %v653_v35  ;;  %v590_v38 = vmul.f32 %v1600_v22, %v542_v15 }
 0x1b0   : > { %v1602_v39 = vpop.eup %1601  ;;  %1530 = vmatmul.mubr.bf16.gmra.mxu1 %v654_v25  ;;  %v1097_v61 = vpop.permute.xlu1 %1096 }
 0x1b1   : > { %v589_v41 = vmul.f32 %v1602_v39, %v541_v37  ;;  %v610_v43 = vmul.f32 %v1917_v57, %v590_v38 }
 0x1b2   : > { %v1604_v46 = vpop.eup %1603 }
 0x1b3   : > { %v609_v32 = vmul.f32 %v1917_v57, %v589_v41  ;;  %v630_v18 = vadd.f32 %v1931_v8, %v610_v43  ;;  %v592_v31 = vmul.f32 %v1604_v46, %v544_v40 }
 0x1b4   : > { %v1606_v9 = vpop.eup %1605  ;;  %1548 = vmatmul.mubr.msk.bf16.gmra.mxu0 %vm1104_vm1, %v1093_v16 }
 0x1b5   : > { %v629_v7 = vadd.f32 %v1931_v8, %v609_v32  ;;  %v591_v10 = vmul.f32 %v1606_v9, %v543_v45  ;;  %v612_v49 = vmul.f32 %v1917_v57, %v592_v31  ;;  %v646_v52 = vmax.f32 %v630_v18, 0.0 }
 0x1b7   : > { %v645_v51 = vmax.f32 %v629_v7, 0.0  ;;  %v611_v11 = vmul.f32 %v1917_v57, %v591_v10  ;;  %v632_v21 = vadd.f32 %v1931_v8, %v612_v49  ;;  %v1095_v57 = vpop.permute.xlu0 %1094 }
 0x1b8   : > { %1551 = vmatprep.mubr.msk.bf16.mxu0 %vm1104_vm1, %v1095_v57 }
 0x1b9   : > { %v655_v55 = vpack.c.bf16 %v646_v52, %v645_v51  ;;  %v631_v56 = vadd.f32 %v1931_v8, %v611_v11  ;;  %v648_v42 = vmax.f32 %v632_v21, 0.0  ;;  %v2025_v8 = vld [vmem:[%s2351_s2 + $0x3] ss:$0 sm:$0xff] }
 0x1bb   : > { %1533 = vmatprep.mubr.bf16.mxu1 %v655_v55  ;;  %v647_v30 = vmax.f32 %v631_v56, 0.0 }
 0x1bc   : > { %1552 = vmatmul.mubr.msk.bf16.gmra.mxu0 %vm1104_vm1, %v1097_v61 }
 0x1bd   : > { %v656_v2 = vpack.c.bf16 %v648_v42, %v647_v30 }
 0x1bf   : > { %1534 = vmatmul.mubr.bf16.gmra.mxu1 %v656_v2 }
 0x253   : > { %v1523_v63 = vpop.f32.mrf.mxu1 }
 0x254   : > { %v2028_v0 = vadd.f32 %v1523_v63, %v2025_v8 }
 0x255   : > { %v743_v1 = vpop.f32.mrf.mxu1 }
 0x256   : > { %810 = vadd.xlane.f32.xlu0 %v2028_v0  ;;  %v2032_v59 = vadd.f32 %v2025_v8, %v743_v1  ;;  %v856_v53 = vmul.f32 %v2028_v0, %v2028_v0 }
 0x257   : > { %v1524_v54 = vpop.f32.mrf.mxu1 }
 0x258   : > { %v2035_v44 = vadd.f32 %v1524_v54, %v2025_v8  ;;  %v854_v4 = vmul.f32 %v2032_v59, %v2032_v59 }
 0x259   : > { %v746_v3 = vpop.f32.mrf.mxu1 }
 0x25a   : > { %v2038_v6 = vadd.f32 %v2025_v8, %v746_v3  ;;  %806 = vadd.xlane.f32.xlu0 %v2032_v59  ;;  %v857_v12 = vmul.f32 %v2035_v44, %v2035_v44 }
 0x25c   : > { %808 = vadd.xlane.f32.xlu1 %v2038_v6  ;;  %v855_v20 = vmul.f32 %v2038_v6, %v2038_v6 }
 0x25e   : > { %874 = vadd.xlane.f32.xlu0 %v856_v53 }
 0x260   : > { %876 = vadd.xlane.f32.xlu1 %v857_v12  ;;  %v1527_v17 = vpop.f32.mrf.mxu1 }
 0x261   : > { %v2055_v13 = vadd.f32 %v1527_v17, %v2025_v8 }
 0x262   : > { %812 = vadd.xlane.f32.xlu0 %v2035_v44  ;;  %v759_v58 = vpop.f32.mrf.mxu1 }
 0x263   : > { %v2063_v62 = vadd.f32 %v2025_v8, %v759_v58  ;;  %v860_v29 = vmul.f32 %v2055_v13, %v2055_v13 }
 0x264   : > { %872 = vadd.xlane.f32.xlu1 %v855_v20  ;;  %v1528_v60 = vpop.f32.mrf.mxu1 }
 0x265   : > { %v2052_v36 = vadd.f32 %v1528_v60, %v2025_v8  ;;  %v858_v34 = vmul.f32 %v2063_v62, %v2063_v62 }
 0x266   : > { %870 = vadd.xlane.f32.xlu0 %v854_v4  ;;  %v762_v23 = vpop.f32.mrf.mxu1 }
 0x267   : > { %v2059_v26 = vadd.f32 %v2025_v8, %v762_v23  ;;  %v861_v24 = vmul.f32 %v2052_v36, %v2052_v36 }
 0x268   : > { %820 = vadd.xlane.f32.xlu1 %v2052_v36 }
 0x269   : > { %v859_v19 = vmul.f32 %v2059_v26, %v2059_v26 }
 0x26a   : > { %818 = vadd.xlane.f32.xlu0 %v2055_v13 }
 0x26c   : > { %816 = vadd.xlane.f32.xlu1 %v2059_v26 }
 0x26e   : > { %814 = vadd.xlane.f32.xlu0 %v2063_v62 }
 0x270   : > { %884 = vadd.xlane.f32.xlu1 %v861_v24  ;;  %v1531_v27 = vpop.f32.mrf.mxu1 }
 0x271   : > { %v2079_v22 = vadd.f32 %v1531_v27, %v2025_v8 }
 0x272   : > { %882 = vadd.xlane.f32.xlu0 %v860_v29  ;;  %v775_v47 = vpop.f32.mrf.mxu1 }
 0x273   : > { %v2087_v37 = vadd.f32 %v2025_v8, %v775_v47  ;;  %v864_v40 = vmul.f32 %v2079_v22, %v2079_v22 }
 0x274   : > { %880 = vadd.xlane.f32.xlu1 %v859_v19  ;;  %v1532_v5 = vpop.f32.mrf.mxu1 }
 0x275   : > { %v2076_v15 = vadd.f32 %v1532_v5, %v2025_v8  ;;  %v862_v14 = vmul.f32 %v2087_v37, %v2087_v37 }
 0x276   : > { %878 = vadd.xlane.f32.xlu0 %v858_v34  ;;  %v778_v35 = vpop.f32.mrf.mxu1 }
 0x277   : > { %v2083_v25 = vadd.f32 %v2025_v8, %v778_v35  ;;  %v865_v38 = vmul.f32 %v2076_v15, %v2076_v15 }
 0x278   : > { %828 = vadd.xlane.f32.xlu1 %v2076_v15 }
 0x279   : > { %v863_v43 = vmul.f32 %v2083_v25, %v2083_v25 }
 0x27a   : > { %826 = vadd.xlane.f32.xlu0 %v2079_v22 }
 0x27c   : > { %824 = vadd.xlane.f32.xlu1 %v2083_v25 }
 0x27e   : > { %822 = vadd.xlane.f32.xlu0 %v2087_v37 }
 0x27f   : > { %v1535_v39 = vpop.f32.mrf.mxu1 }
 0x280   : > { %892 = vadd.xlane.f32.xlu1 %v865_v38  ;;  %v2103_v32 = vadd.f32 %v1535_v39, %v2025_v8 }
 0x281   : > { %v791_v41 = vpop.f32.mrf.mxu1 }
 0x282   : > { %890 = vadd.xlane.f32.xlu0 %v864_v40  ;;  %v2111_v31 = vadd.f32 %v2025_v8, %v791_v41  ;;  %v868_v49 = vmul.f32 %v2103_v32, %v2103_v32 }
 0x283   : > { %v1536_v46 = vpop.f32.mrf.mxu1 }
 0x284   : > { %888 = vadd.xlane.f32.xlu1 %v863_v43  ;;  %v2098_v48 = vadd.f32 %v1536_v46, %v2025_v8  ;;  %v866_v7 = vmul.f32 %v2111_v31, %v2111_v31 }
 0x285   : > { %v794_v45 = vpop.f32.mrf.mxu1 }
 0x286   : > { %886 = vadd.xlane.f32.xlu0 %v862_v14  ;;  %v2107_v18 = vadd.f32 %v2025_v8, %v794_v45  ;;  %v869_v10 = vmul.f32 %v2098_v48, %v2098_v48  ;;  %v1541_v14 = vpop.f32.mrf.mxu0 }
 0x288   : > { %836 = vadd.xlane.f32.xlu1 %v2098_v48  ;;  %v867_v9 = vmul.f32 %v2107_v18, %v2107_v18 }
 0x28a   : > { %834 = vadd.xlane.f32.xlu0 %v2103_v32 }
 0x28c   : > { %832 = vadd.xlane.f32.xlu1 %v2107_v18 }
 0x28e   : > { %830 = vadd.xlane.f32.xlu0 %v2111_v31 }
 0x290   : > { %896 = vadd.xlane.f32.xlu1 %v867_v9 }
 0x292   : > { %894 = vadd.xlane.f32.xlu0 %v866_v7 }
 0x294   : > { %900 = vadd.xlane.f32.xlu1 %v869_v10 }
 0x296   : > { %898 = vadd.xlane.f32.xlu0 %v868_v49 }
 0x2df   : > { %v811_v50 = vpop.xlane.xlu0 %810 }
 0x2e0   : > { %v840_v52 = vmul.f32 0.0078125, %v811_v50 }
 0x2e2   : > { %v920_v55 = vmul.f32 %v840_v52, %v840_v52  ;;  %v968_v7 = vsub.f32 %v2028_v0, %v840_v52  ;;  %v2158_v0 = vld [vmem:[%s2351_s2 + $0x6] ss:$0 sm:$0xff]  ;;  %v1163_v52 = vpop.f32.mrf.mxu0 }
 0x2e3   : > { %v807_v51 = vpop.xlane.xlu0 %806 }
 0x2e4   : > { %v2125_v2 = vmul.f32 0.0078125, %v807_v51 }
 0x2e5   : > { %v809_v11 = vpop.xlane.xlu1 %808 }
 0x2e6   : > { %v2123_v28 = vmul.f32 0.0078125, %v809_v11  ;;  %v918_v53 = vmul.f32 %v2125_v2, %v2125_v2 }
 0x2e7   : > { %v875_v21 = vpop.xlane.xlu0 %874 }
 0x2e8   : > { %v904_v56 = vmul.f32 0.0078125, %v875_v21  ;;  %v919_v61 = vmul.f32 %v2123_v28, %v2123_v28 }
 0x2e9   : > { %v877_v30 = vpop.xlane.xlu1 %876 }
 0x2ea   : > { %v936_v42 = vsub.f32 %v904_v56, %v920_v55  ;;  %v905_v1 = vmul.f32 0.0078125, %v877_v30 }
 0x2eb   : > { %v813_v33 = vpop.xlane.xlu0 %812 }
 0x2ec   : > { %v952_v16 = vmax.f32 %v936_v42, 0.0  ;;  %v2127_v57 = vmul.f32 0.0078125, %v813_v33  ;;  %v2153_v42 = vld [vmem:[%s2351_s2 + $0x4] ss:$0 sm:$0xff] }
 0x2ed   : > { %v873_v8 = vpop.xlane.xlu1 %872 }
 0x2ee   : > { %v984_v63 = vadd.f32 1e-05, %v952_v16  ;;  %v921_v54 = vmul.f32 %v2127_v57, %v2127_v57  ;;  %v903_v3 = vmul.f32 0.0078125, %v873_v8 }
 0x2ef   : > { %v871_v12 = vpop.xlane.xlu0 %870 }
 0x2f0   : > { %1607 = vrsqrt.f32 %v984_v63  ;;  %v937_v17 = vsub.f32 %v905_v1, %v921_v54  ;;  %v935_v20 = vsub.f32 %v903_v3, %v919_v61  ;;  %v902_v58 = vmul.f32 0.0078125, %v871_v12  ;;  %v2165_v3 = vld [vmem:[%s2351_s2 + $0x5] ss:$0 sm:$0xff] }
 0x2f1   : > { %v821_v4 = vpop.xlane.xlu1 %820 }
 0x2f2   : > { %v953_v60 = vmax.f32 %v937_v17, 0.0  ;;  %v951_v23 = vmax.f32 %v935_v20, 0.0  ;;  %v934_v24 = vsub.f32 %v902_v58, %v918_v53  ;;  %v2135_v35 = vmul.f32 0.0078125, %v821_v4 }
 0x2f3   : > { %v819_v27 = vpop.xlane.xlu0 %818  ;;  %v969_v53 = vsub.f32 %v2035_v44, %v2127_v57  ;;  %v1172_v20 = vadd.f32 %v1541_v14, %v2158_v0 }
 0x2f4   : > { %v985_v29 = vadd.f32 1e-05, %v953_v60  ;;  %v950_v47 = vmax.f32 %v934_v24, 0.0  ;;  %v983_v19 = vadd.f32 1e-05, %v951_v23  ;;  %v2137_v39 = vmul.f32 0.0078125, %v819_v27  ;;  %v1542_v23 = vpop.f32.mrf.mxu0 }
 0x2f5   : > { %v817_v5 = vpop.xlane.xlu1 %816  ;;  %v925_v43 = vmul.f32 %v2135_v35, %v2135_v35  ;;  %v966_v27 = vsub.f32 %v2032_v59, %v2125_v2  ;;  %v2180_v59 = vld [vmem:[%s2351_s2 + $0x7] ss:$0 sm:$0xff]  ;;  %v967_v2 = vsub.f32 %v2038_v6, %v2123_v28 }
 0x2f6   : > { %1609 = vrsqrt.f32 %v985_v29  ;;  %v982_v34 = vadd.f32 1e-05, %v950_v47  ;;  %v2139_v40 = vmul.f32 0.0078125, %v817_v5  ;;  %v924_v10 = vmul.f32 %v2137_v39, %v2137_v39 }
 0x2f7   : > { %v815_v38 = vpop.xlane.xlu0 %814 }
 0x2f8   : > { %1611 = vrsqrt.f32 %v982_v34  ;;  %v2143_v45 = vmul.f32 0.0078125, %v815_v38  ;;  %v923_v11 = vmul.f32 %v2139_v40, %v2139_v40 }
 0x2f9   : > { %1613 = vrsqrt.f32 %v983_v19  ;;  %v885_v41 = vpop.xlane.xlu1 %884 }
 0x2fa   : > { %v909_v46 = vmul.f32 0.0078125, %v885_v41  ;;  %v922_v16 = vmul.f32 %v2143_v45, %v2143_v45 }
 0x2fb   : > { %v883_v9 = vpop.xlane.xlu0 %882 }
 0x2fc   : > { %v941_v49 = vsub.f32 %v909_v46, %v925_v43  ;;  %v908_v50 = vmul.f32 0.0078125, %v883_v9  ;;  %v1175_v9 = vadd.f32 %v1542_v23, %v2158_v0 }
 0x2fd   : > { %v1608_v51 = vpop.eup %1607  ;;  %v881_v21 = vpop.xlane.xlu1 %880 }
 0x2fe   : > { %v957_v55 = vmax.f32 %v941_v49, 0.0  ;;  %v940_v56 = vsub.f32 %v908_v50, %v924_v10  ;;  %v907_v30 = vmul.f32 0.0078125, %v881_v21  ;;  %v1016_v33 = vmul.f32 %v1608_v51, %v968_v7  ;;  %v1166_v7 = vpop.f32.mrf.mxu0 }
 0x2ff   : > { %v879_v61 = vpop.xlane.xlu0 %878 }
 0x300   : > { %v989_v8 = vadd.f32 1e-05, %v957_v55  ;;  %v956_v63 = vmax.f32 %v940_v56, 0.0  ;;  %v939_v1 = vsub.f32 %v907_v30, %v923_v11  ;;  %v906_v54 = vmul.f32 0.0078125, %v879_v61  ;;  %v1545_v55 = vpop.f32.mrf.mxu0 }
 0x301   : > { %v829_v12 = vpop.xlane.xlu1 %828  ;;  %v1036_v17 = vmul.f32 %v2153_v42, %v1016_v33  ;;  %v1164_v11 = vadd.f32 %v2158_v0, %v1163_v52 }
 0x302   : > { %1615 = vrsqrt.f32 %v989_v8  ;;  %v988_v58 = vadd.f32 1e-05, %v956_v63  ;;  %v955_v4 = vmax.f32 %v939_v1, 0.0  ;;  %v938_v60 = vsub.f32 %v906_v54, %v922_v16 }
 0x303   : > { %v1610_v24 = vpop.eup %1609  ;;  %v1056_v29 = vadd.f32 %v2165_v3, %v1036_v17  ;;  %v827_v47 = vpop.xlane.xlu0 %826  ;;  %v2174_v46 = vmul.f32 0.0078125, %v829_v12  ;;  %v1167_v1 = vadd.f32 %v2158_v0, %v1166_v7 }
 0x304   : > { %v1017_v19 = vmul.f32 %v1610_v24, %v969_v53  ;;  %1617 = vrsqrt.f32 %v988_v58  ;;  %v987_v44 = vadd.f32 1e-05, %v955_v4  ;;  %v954_v57 = vmax.f32 %v938_v60, 0.0  ;;  %v1179_v4 = vpop.f32.mrf.mxu0 }
 0x305   : > { %v1612_v5 = vpop.eup %1611  ;;  %v1228_v34 = vadd.f32 %v1172_v20, %v1056_v29  ;;  %v825_v38 = vpop.xlane.xlu1 %824  ;;  %v2187_v21 = vmul.f32 0.0078125, %v827_v47  ;;  %v929_v28 = vmul.f32 %v2174_v46, %v2174_v46  ;;  %v2199_v53 = vadd.f32 %v1545_v55, %v2158_v0 }
 0x306   : > { %v1614_v41 = vpop.eup %1613  ;;  %v986_v43 = vadd.f32 1e-05, %v954_v57  ;;  %v1014_v14 = vmul.f32 %v1612_v5, %v966_v27  ;;  %1619 = vrsqrt.f32 %v987_v44  ;;  %v1037_v49 = vmul.f32 %v2153_v42, %v1017_v19 }
 0x307   : > { %v1244_v10 = vmax.f32 %v1228_v34, 0.0  ;;  %v823_v50 = vpop.xlane.xlu0 %822  ;;  %v2189_v56 = vmul.f32 0.0078125, %v825_v38  ;;  %v1015_v33 = vmul.f32 %v1614_v41, %v967_v2  ;;  %v928_v17 = vmul.f32 %v2187_v21, %v2187_v21 }
 0x308   : > { %1621 = vrsqrt.f32 %v986_v43  ;;  %v1034_v51 = vmul.f32 %v2153_v42, %v1014_v14  ;;  %v1057_v30 = vadd.f32 %v2165_v3, %v1037_v49  ;;  %v2206_v27 = vmul.f32 0.0078125, %v823_v50  ;;  %v1546_v49 = vpop.f32.mrf.mxu0 }
 0x309   : > { %v893_v16 = vpop.xlane.xlu1 %892  ;;  %v1264_v6 = vmul.f32 %v2180_v59, %v1244_v10  ;;  %v1035_v52 = vmul.f32 %v2153_v42, %v1015_v33  ;;  %v927_v60 = vmul.f32 %v2189_v56, %v2189_v56  ;;  %v973_v34 = vsub.f32 %v2052_v36, %v2135_v35 }
 0x30a   : > { %v1054_v61 = vadd.f32 %v2165_v3, %v1034_v51  ;;  %v913_v8 = vmul.f32 0.0078125, %v893_v16  ;;  %v1229_v63 = vadd.f32 %v1175_v9, %v1057_v30  ;;  %v972_v38 = vsub.f32 %v2055_v13, %v2137_v39 }
 0x30b   : > { %1282 = vadd.xlane.f32.xlu0 %v1264_v6  ;;  %v891_v54 = vpop.xlane.xlu0 %890  ;;  %v1055_v24 = vadd.f32 %v2165_v3, %v1035_v52  ;;  %v1191_v6 = vadd.f32 %v1546_v49, %v2158_v0 }
 0x30c   : > { %v1226_v12 = vadd.f32 %v1164_v11, %v1054_v61  ;;  %v945_v20 = vsub.f32 %v913_v8, %v929_v28  ;;  %v912_v58 = vmul.f32 0.0078125, %v891_v54  ;;  %v1245_v23 = vmax.f32 %v1229_v63, 0.0  ;;  %v1182_v54 = vpop.f32.mrf.mxu0 }
 0x30d   : > { %v889_v29 = vpop.xlane.xlu1 %888  ;;  %v1227_v41 = vadd.f32 %v1167_v1, %v1055_v24  ;;  %v926_v11 = vmul.f32 %v2206_v27, %v2206_v27  ;;  %v970_v63 = vsub.f32 %v2063_v62, %v2143_v45  ;;  %v1180_v45 = vadd.f32 %v2158_v0, %v1179_v4 }
 0x30e   : > { %v1242_v47 = vmax.f32 %v1226_v12, 0.0  ;;  %v961_v19 = vmax.f32 %v945_v20, 0.0  ;;  %v944_v44 = vsub.f32 %v912_v58, %v928_v17  ;;  %v911_v57 = vmul.f32 0.0078125, %v889_v29  ;;  %v1549_v29 = vpop.f32.mrf.mxu0 }
 0x30f   : > { %v1616_v5 = vpop.eup %1615  ;;  %v887_v43 = vpop.xlane.xlu0 %886  ;;  %v1265_v14 = vmul.f32 %v2180_v59, %v1245_v23  ;;  %v1243_v51 = vmax.f32 %v1227_v41, 0.0  ;;  %v1183_v41 = vadd.f32 %v2158_v0, %v1182_v54 }
 0x310   : > { %v993_v9 = vadd.f32 1e-05, %v961_v19  ;;  %v960_v7 = vmax.f32 %v944_v44, 0.0  ;;  %v943_v2 = vsub.f32 %v911_v57, %v927_v60  ;;  %v910_v10 = vmul.f32 0.0078125, %v887_v43 }
 0x311   : > { %v1618_v50 = vpop.eup %1617  ;;  %1284 = vadd.xlane.f32.xlu1 %v1265_v14  ;;  %v837_v55 = vpop.xlane.xlu1 %836  ;;  %v1262_v36 = vmul.f32 %v2180_v59, %v1242_v47  ;;  %v1021_v35 = vmul.f32 %v1616_v5, %v973_v34  ;;  %v1263_v61 = vmul.f32 %v2180_v59, %v1243_v51  ;;  %v971_v60 = vsub.f32 %v2059_v26, %v2139_v40 }
 0x312   : > { %1623 = vrsqrt.f32 %v993_v9  ;;  %v992_v13 = vadd.f32 1e-05, %v960_v7  ;;  %v959_v39 = vmax.f32 %v943_v2, 0.0  ;;  %v1020_v30 = vmul.f32 %v1618_v50, %v972_v38 }
 0x313   : > { %v942_v33 = vsub.f32 %v910_v10, %v926_v11  ;;  %1278 = vadd.xlane.f32.xlu0 %v1262_v36  ;;  %v1041_v16 = vmul.f32 %v2153_v42, %v1021_v35  ;;  %v835_v28 = vpop.xlane.xlu0 %834  ;;  %v1620_v8 = vpop.eup %1619  ;;  %v2233_v26 = vmul.f32 0.0078125, %v837_v55 }
 0x314   : > { %1625 = vrsqrt.f32 %v992_v13  ;;  %v991_v52 = vadd.f32 1e-05, %v959_v39  ;;  %v1040_v1 = vmul.f32 %v2153_v42, %v1020_v30  ;;  %v1019_v34 = vmul.f32 %v1620_v8, %v971_v60 }
 0x315   : > { %v1622_v12 = vpop.eup %1621  ;;  %v958_v17 = vmax.f32 %v942_v33, 0.0  ;;  %v1061_v20 = vadd.f32 %v2165_v3, %v1041_v16  ;;  %1280 = vadd.xlane.f32.xlu1 %v1263_v61  ;;  %v833_v58 = vpop.xlane.xlu1 %832  ;;  %v2237_v9 = vmul.f32 0.0078125, %v835_v28  ;;  %v933_v13 = vmul.f32 %v2233_v26, %v2233_v26 }
 0x316   : > { %1627 = vrsqrt.f32 %v991_v52  ;;  %v1060_v23 = vadd.f32 %v2165_v3, %v1040_v1  ;;  %v1018_v24 = vmul.f32 %v1622_v12, %v970_v63  ;;  %v2227_v19 = vmul.f32 0.0078125, %v833_v58 }
 0x317   : > { %v990_v62 = vadd.f32 1e-05, %v958_v17  ;;  %v1233_v47 = vadd.f32 %v1191_v6, %v1061_v20  ;;  %v831_v44 = vpop.xlane.xlu0 %830  ;;  %v1039_v7 = vmul.f32 %v2153_v42, %v1019_v34  ;;  %v1204_v33 = vadd.f32 %v1549_v29, %v2158_v0 }
 0x318   : > { %v1232_v57 = vadd.f32 %v2199_v53, %v1060_v23  ;;  %v1038_v5 = vmul.f32 %v2153_v42, %v1018_v24  ;;  %v2231_v38 = vmul.f32 0.0078125, %v831_v44  ;;  %v2240_v53 = vpop.f32.mrf.mxu0  ;;  %v931_v2 = vmul.f32 %v2227_v19, %v2227_v19 }
 0x319   : > { %1629 = vrsqrt.f32 %v990_v62  ;;  %v1249_v40 = vmax.f32 %v1233_v47, 0.0  ;;  %v897_v43 = vpop.xlane.xlu1 %896  ;;  %v1059_v55 = vadd.f32 %v2165_v3, %v1039_v7  ;;  %v977_v52 = vsub.f32 %v2076_v15, %v2174_v46 }
 0x31a   : > { %v1248_v14 = vmax.f32 %v1232_v57, 0.0  ;;  %v1058_v4 = vadd.f32 %v2165_v3, %v1038_v5  ;;  %v930_v10 = vmul.f32 %v2231_v38, %v2231_v38  ;;  %v915_v49 = vmul.f32 0.0078125, %v897_v43  ;;  %v1550_v8 = vpop.f32.mrf.mxu0 }
 0x31b   : > { %v895_v50 = vpop.xlane.xlu0 %894  ;;  %v1269_v51 = vmul.f32 %v2180_v59, %v1249_v40  ;;  %v1231_v6 = vadd.f32 %v1183_v41, %v1059_v55  ;;  %v976_v1 = vsub.f32 %v2079_v22, %v2187_v21  ;;  %v932_v54 = vmul.f32 %v2237_v9, %v2237_v9 }
 0x31c   : > { %v1230_v11 = vadd.f32 %v1180_v45, %v1058_v4  ;;  %v914_v36 = vmul.f32 0.0078125, %v895_v50  ;;  %v1268_v35 = vmul.f32 %v2180_v59, %v1248_v14  ;;  %v947_v39 = vsub.f32 %v915_v49, %v931_v2  ;;  %v1198_v21 = vpop.f32.mrf.mxu0 }
 0x31d   : > { %1292 = vadd.xlane.f32.xlu1 %v1269_v51  ;;  %v901_v30 = vpop.xlane.xlu1 %900  ;;  %v1247_v20 = vmax.f32 %v1231_v6, 0.0  ;;  %v1207_v47 = vadd.f32 %v1550_v8, %v2158_v0  ;;  %v975_v5 = vsub.f32 %v2083_v25, %v2189_v56  ;;  %v974_v4 = vsub.f32 %v2087_v37, %v2206_v27 }
 0x31e   : > { %v1246_v16 = vmax.f32 %v1230_v11, 0.0  ;;  %v946_v28 = vsub.f32 %v914_v36, %v930_v10  ;;  %v917_v61 = vmul.f32 0.0078125, %v901_v30  ;;  %1290 = vadd.xlane.f32.xlu0 %v1268_v35  ;;  %v963_v12 = vmax.f32 %v947_v39, 0.0  ;;  %v1553_v49 = vpop.f32.mrf.mxu0 }
 0x31f   : > { %v1624_v63 = vpop.eup %1623  ;;  %v899_v17 = vpop.xlane.xlu0 %898  ;;  %v1267_v34 = vmul.f32 %v2180_v59, %v1247_v20  ;;  %v1199_v55 = vadd.f32 %v2158_v0, %v1198_v21 }
 0x320   : > { %v962_v58 = vmax.f32 %v946_v28, 0.0  ;;  %v949_v60 = vsub.f32 %v917_v61, %v933_v13  ;;  %v916_v23 = vmul.f32 0.0078125, %v899_v17  ;;  %v995_v29 = vadd.f32 1e-05, %v963_v12  ;;  %v1211_v39 = vpop.f32.mrf.mxu0 }
 0x321   : > { %v1626_v24 = vpop.eup %1625  ;;  %v1266_v62 = vmul.f32 %v2180_v59, %v1246_v16  ;;  %v1025_v45 = vmul.f32 %v1624_v63, %v977_v52  ;;  %1288 = vadd.xlane.f32.xlu1 %v1267_v34  ;;  %v1196_v16 = vadd.f32 %v2158_v0, %v2240_v53  ;;  %v979_v52 = vsub.f32 %v2107_v18, %v2227_v19 }
 0x322   : > { %v994_v15 = vadd.f32 1e-05, %v962_v58  ;;  %v965_v46 = vmax.f32 %v949_v60, 0.0  ;;  %v1024_v44 = vmul.f32 %v1626_v24, %v976_v1  ;;  %v948_v22 = vsub.f32 %v916_v23, %v932_v54  ;;  %v1554_v63 = vpop.f32.mrf.mxu0 }
 0x323   : > { %v1628_v57 = vpop.eup %1627  ;;  %1631 = vrsqrt.f32 %v995_v29  ;;  %1286 = vadd.xlane.f32.xlu0 %v1266_v62  ;;  %v1045_v40 = vmul.f32 %v2153_v42, %v1025_v45  ;;  %v978_v53 = vsub.f32 %v2111_v31, %v2231_v38  ;;  %v981_v60 = vsub.f32 %v2098_v48, %v2233_v26 }
 0x324   : > { %1633 = vrsqrt.f32 %v994_v15  ;;  %v997_v41 = vadd.f32 1e-05, %v965_v46  ;;  %v1044_v43 = vmul.f32 %v2153_v42, %v1024_v44  ;;  %v964_v14 = vmax.f32 %v948_v22, 0.0  ;;  %v1214_v24 = vpop.f32.mrf.mxu0 }
 0x325   : > { %v1065_v7 = vadd.f32 %v2165_v3, %v1045_v40  ;;  %v1023_v2 = vmul.f32 %v1628_v57, %v975_v5  ;;  %v980_v19 = vsub.f32 %v2103_v32, %v2237_v9  ;;  %v1212_v26 = vadd.f32 %v2158_v0, %v1211_v39 }
 0x326   : > { %v1630_v10 = vpop.eup %1629  ;;  %1635 = vrsqrt.f32 %v997_v41  ;;  %v1064_v25 = vadd.f32 %v2165_v3, %v1044_v43  ;;  %v996_v56 = vadd.f32 1e-05, %v964_v14  ;;  %v1223_v9 = vadd.f32 %v1554_v63, %v2158_v0 }
 0x327   : > { %v1022_v50 = vmul.f32 %v1630_v10, %v974_v4  ;;  %v1237_v51 = vadd.f32 %v1207_v47, %v1065_v7  ;;  %v1043_v11 = vmul.f32 %v2153_v42, %v1023_v2  ;;  %v1215_v47 = vadd.f32 %v2158_v0, %v1214_v24 }
 0x328   : > { %v1236_v36 = vadd.f32 %v1204_v33, %v1064_v25  ;;  %1637 = vrsqrt.f32 %v996_v56  ;;  %v1220_v34 = vadd.f32 %v1553_v49, %v2158_v0  ;;  %v1447_v0 = vld [vmem:[%s2351_s2 + $0x8] ss:$0 sm:$0xff] }
 0x329   : > { %v1042_v37 = vmul.f32 %v2153_v42, %v1022_v50  ;;  %v1253_v27 = vmax.f32 %v1237_v51, 0.0  ;;  %v1063_v35 = vadd.f32 %v2165_v3, %v1043_v11 }
 0x32a   : > { %v1252_v13 = vmax.f32 %v1236_v36, 0.0 }
 0x32b   : > { %v1062_v30 = vadd.f32 %v2165_v3, %v1042_v37  ;;  %v1235_v6 = vadd.f32 %v1199_v55, %v1063_v35  ;;  %v1273_v28 = vmul.f32 %v2180_v59, %v1253_v27 }
 0x32c   : > { %v1272_v61 = vmul.f32 %v2180_v59, %v1252_v13 }
 0x32d   : > { %v1234_v8 = vadd.f32 %v1196_v16, %v1062_v30  ;;  %v1251_v33 = vmax.f32 %v1235_v6, 0.0  ;;  %1300 = vadd.xlane.f32.xlu1 %v1273_v28 }
 0x32e   : > { %1298 = vadd.xlane.f32.xlu0 %v1272_v61 }
 0x32f   : > { %v1250_v1 = vmax.f32 %v1234_v8, 0.0  ;;  %v1271_v54 = vmul.f32 %v2180_v59, %v1251_v33 }
 0x330   : > { %v1632_v12 = vpop.eup %1631 }
 0x331   : > { %v1634_v17 = vpop.eup %1633  ;;  %v1027_v20 = vmul.f32 %v1632_v12, %v979_v52  ;;  %1296 = vadd.xlane.f32.xlu1 %v1271_v54  ;;  %v1270_v58 = vmul.f32 %v2180_v59, %v1250_v1 }
 0x332   : > { %v1026_v23 = vmul.f32 %v1634_v17, %v978_v53 }
 0x333   : > { %v1636_v29 = vpop.eup %1635  ;;  %v1047_v18 = vmul.f32 %v2153_v42, %v1027_v20  ;;  %1294 = vadd.xlane.f32.xlu0 %v1270_v58 }
 0x334   : > { %v1046_v62 = vmul.f32 %v2153_v42, %v1026_v23  ;;  %v1029_v31 = vmul.f32 %v1636_v29, %v981_v60 }
 0x335   : > { %v1638_v38 = vpop.eup %1637  ;;  %v1067_v45 = vadd.f32 %v2165_v3, %v1047_v18 }
 0x336   : > { %v1028_v15 = vmul.f32 %v1638_v38, %v980_v19  ;;  %v1066_v48 = vadd.f32 %v2165_v3, %v1046_v62  ;;  %v1049_v46 = vmul.f32 %v2153_v42, %v1029_v31 }
 0x337   : > { %v1239_v44 = vadd.f32 %v1215_v47, %v1067_v45 }
 0x338   : > { %v1048_v22 = vmul.f32 %v2153_v42, %v1028_v15  ;;  %v1238_v21 = vadd.f32 %v1212_v26, %v1066_v48  ;;  %v1069_v32 = vadd.f32 %v2165_v3, %v1049_v46 }
 0x339   : > { %v1255_v57 = vmax.f32 %v1239_v44, 0.0 }
 0x33a   : > { %v1068_v5 = vadd.f32 %v2165_v3, %v1048_v22  ;;  %v1254_v40 = vmax.f32 %v1238_v21, 0.0  ;;  %v1241_v41 = vadd.f32 %v1223_v9, %v1069_v32 }
 0x33b   : > { %v1275_v43 = vmul.f32 %v2180_v59, %v1255_v57 }
 0x33c   : > { %v1240_v14 = vadd.f32 %v1220_v34, %v1068_v5  ;;  %v1257_v4 = vmax.f32 %v1241_v41, 0.0  ;;  %v1274_v7 = vmul.f32 %v2180_v59, %v1254_v40 }
 0x33d   : > { %1304 = vadd.xlane.f32.xlu1 %v1275_v43 }
 0x33e   : > { %v1256_v42 = vmax.f32 %v1240_v14, 0.0  ;;  %1302 = vadd.xlane.f32.xlu0 %v1274_v7  ;;  %v1277_v2 = vmul.f32 %v2180_v59, %v1257_v4 }
 0x340   : > { %v1276_v10 = vmul.f32 %v2180_v59, %v1256_v42 }
 0x341   : > { %1308 = vadd.xlane.f32.xlu1 %v1277_v2 }
 0x342   : > { %1306 = vadd.xlane.f32.xlu0 %v1276_v10 }
 0x394   : > { %v1283_v3 = vpop.xlane.xlu0 %1282 }
 0x395   : > { %v1316_v59 = vadd.f32 %v1447_v0, %v1283_v3 }
 0x397   : > { %1333 = vst.msk [vmem:[%s2312_s11 + $0x10] sm:$0xff] %vm1330_vm2, %v1316_v59 }
 0x39a   : > { %v1285_v25 = vpop.xlane.xlu1 %1284 }
 0x39b   : > { %v1317_v56 = vadd.f32 %v1447_v0, %v1285_v25 }
 0x39c   : > { %v1279_v49 = vpop.xlane.xlu0 %1278 }
 0x39d   : > { %1334 = vst.msk [vmem:[%s2312_s11 + $0x18] sm:$0xff] %vm1330_vm2, %v1317_v56  ;;  %v1314_v50 = vadd.f32 %v1447_v0, %v1279_v49 }
 0x39e   : > { %v1281_v51 = vpop.xlane.xlu1 %1280 }
 0x39f   : > { %1331 = vst.msk [vmem:[%s2312_s11] sm:$0xff] %vm1330_vm2, %v1314_v50  ;;  %v1315_v11 = vadd.f32 %v1447_v0, %v1281_v51 }
 0x3a1   : > { %1332 = vst.msk [vmem:[%s2312_s11 + $0x8] sm:$0xff] %vm1330_vm2, %v1315_v11 }
 0x3a6   : > { %v1293_v55 = vpop.xlane.xlu1 %1292 }
 0x3a7   : > { %v1321_v36 = vadd.f32 %v1447_v0, %v1293_v55  ;;  %v1291_v37 = vpop.xlane.xlu0 %1290 }
 0x3a8   : > { %v1320_v27 = vadd.f32 %v1447_v0, %v1291_v37 }
 0x3a9   : > { %1338 = vst.msk [vmem:[%s2312_s11 + $0x38] sm:$0xff] %vm1330_vm2, %v1321_v36 }
 0x3aa   : > { %1337 = vst.msk [vmem:[%s2312_s11 + $0x30] sm:$0xff] %vm1330_vm2, %v1320_v27  ;;  %v1289_v39 = vpop.xlane.xlu1 %1288 }
 0x3ab   : > { %v1319_v30 = vadd.f32 %v1447_v0, %v1289_v39 }
 0x3ac   : > { %v1287_v35 = vpop.xlane.xlu0 %1286 }
 0x3ad   : > { %v1318_v13 = vadd.f32 %v1447_v0, %v1287_v35  ;;  %1336 = vst.msk [vmem:[%s2312_s11 + $0x28] sm:$0xff] %vm1330_vm2, %v1319_v30 }
 0x3af   : > { %1335 = vst.msk [vmem:[%s2312_s11 + $0x20] sm:$0xff] %vm1330_vm2, %v1318_v13 }
 0x3b6   : > { %v1301_v16 = vpop.xlane.xlu1 %1300 }
 0x3b7   : > { %v1325_v6 = vadd.f32 %v1447_v0, %v1301_v16  ;;  %v1299_v28 = vpop.xlane.xlu0 %1298 }
 0x3b8   : > { %v1324_v61 = vadd.f32 %v1447_v0, %v1299_v28 }
 0x3b9   : > { %1342 = vst.msk [vmem:[%s2312_s11 + $0x58] sm:$0xff] %vm1330_vm2, %v1325_v6 }
 0x3ba   : > { %1341 = vst.msk [vmem:[%s2312_s11 + $0x50] sm:$0xff] %vm1330_vm2, %v1324_v61  ;;  %v1297_v8 = vpop.xlane.xlu1 %1296 }
 0x3bb   : > { %v1323_v33 = vadd.f32 %v1447_v0, %v1297_v8 }
 0x3bc   : > { %v1295_v63 = vpop.xlane.xlu0 %1294 }
 0x3bd   : > { %1340 = vst.msk [vmem:[%s2312_s11 + $0x48] sm:$0xff] %vm1330_vm2, %v1323_v33  ;;  %v1322_v52 = vadd.f32 %v1447_v0, %v1295_v63 }
 0x3bf   : > { %1339 = vst.msk [vmem:[%s2312_s11 + $0x40] sm:$0xff] %vm1330_vm2, %v1322_v52 }
 0x3c6   : > { %v1305_v1 = vpop.xlane.xlu1 %1304 }
 0x3c7   : > { %v1327_v54 = vadd.f32 %v1447_v0, %v1305_v1  ;;  %v1303_v12 = vpop.xlane.xlu0 %1302 }
 0x3c8   : > { %v1326_v53 = vadd.f32 %v1447_v0, %v1303_v12 }
 0x3c9   : > { %1344 = vst.msk [vmem:[%s2312_s11 + $0x68] sm:$0xff] %vm1330_vm2, %v1327_v54 }
 0x3ca   : > { %1343 = vst.msk [vmem:[%s2312_s11 + $0x60] sm:$0xff] %vm1330_vm2, %v1326_v53  ;;  %v1309_v17 = vpop.xlane.xlu1 %1308 }
 0x3cb   : > { %v1329_v20 = vadd.f32 %v1447_v0, %v1309_v17  ;;  %v1307_v58 = vpop.xlane.xlu0 %1306 }
 0x3cc   : > { %v1328_v60 = vadd.f32 %v1447_v0, %v1307_v58 }
 0x3cd   : > { %1346 = vst.msk [vmem:[%s2312_s11 + $0x78] sm:$0xff] %vm1330_vm2, %v1329_v20 }
 0x3ce   : > { %1345 = vst.msk [vmem:[%s2312_s11 + $0x70] sm:$0xff] %vm1330_vm2, %v1328_v60 }
 0x3cf PF: > { %s13_s12 = sadd.s32 1, %s1645_s12  }
 0x3d0   : > { %p10_p4 = scmp.ge.s32.totalorder %s13_s12, 4  }
 0x3d2   :  { %12 = sbr.rel (!%p10_p4) target bundleno = 1 (0x1), region = 62 }

</bundles_post_ra>
